<compile_context>
chip_gen: v6e
topology: v6e:2x2x1
jax: 0.10.0
libtpu: 0.0.40
codegen_flags: <defaults>
</compile_context>

<pallas_src>
import math

import jax
import jax.numpy as jnp
from jax.experimental import pallas as pl
from jax.experimental.pallas import tpu as pltpu


# --------------------------------------------------------------------------
# Kernels
# --------------------------------------------------------------------------
def _swiglu_kernel_acc_out(x_ref, w13_ref, w2t_ref, o_ref):
    """f32-output variant: accumulate straight into the resident output block."""
    th = w13_ref.shape[-1] // 2

    @pl.when(pl.program_id(1) == 0)
    def _():
        o_ref[...] = jnp.zeros_like(o_ref)

    # Fused up + gate projection: (mt, D) x (D, 2*th) -> (mt, 2*th), f32 acc.
    gv = jnp.dot(x_ref[...], w13_ref[...], preferred_element_type=jnp.float32)
    g = gv[:, :th]          # lane-aligned slices (th % 128 == 0)
    v = gv[:, th:]
    hblk = (jax.nn.silu(g) * v).astype(jnp.bfloat16)   # gate in f32, cast for MXU
    # Partial down-projection against the (th, D) contiguous weight slab.
    o_ref[...] += jnp.dot(hblk, w2t_ref[...], preferred_element_type=jnp.float32)


def _swiglu_kernel_scratch(x_ref, w13_ref, w2t_ref, o_ref, acc_ref):
    """Generic variant (e.g. bf16 output): f32 accumulator scratch, cast at end."""
    th = w13_ref.shape[-1] // 2
    h = pl.program_id(1)

    @pl.when(h == 0)
    def _():
        acc_ref[...] = jnp.zeros_like(acc_ref)

    gv = jnp.dot(x_ref[...], w13_ref[...], preferred_element_type=jnp.float32)
    g = gv[:, :th]
    v = gv[:, th:]
    hblk = (jax.nn.silu(g) * v).astype(jnp.bfloat16)
    acc_ref[...] += jnp.dot(hblk, w2t_ref[...], preferred_element_type=jnp.float32)

    @pl.when(h == pl.num_programs(1) - 1)
    def _():
        o_ref[...] = acc_ref[...].astype(o_ref.dtype)


# --------------------------------------------------------------------------
# Tile selection (VMEM- and generation-aware)
# --------------------------------------------------------------------------
def _round_up(x, m):
    return ((x + m - 1) // m) * m


def _vmem_budget():
    """(usable VMEM budget in bytes, roofline-driven token-tile target)."""
    try:
        cap = int(getattr(pltpu.get_tpu_info(), "vmem_capacity_bytes", 0)) or (64 << 20)
    except Exception:  # pragma: no cover - conservative fallback
        cap = 64 << 20
    if cap >= (100 << 20):
        # v5e / v6e: 128 MiB physical VMEM; allow large tiles (don't clamp to 64).
        budget = min(110 << 20, cap - (16 << 20))
        mt_target = 1024       # v6e needs ~650 flop / weight-byte to be MXU-bound
    else:
        # v7x: 64 MiB per TensorCore; keep ~8 MiB headroom for Mosaic internals.
        budget = max(32 << 20, cap - (8 << 20))
        mt_target = 512        # ~310 flop/byte per TC is already compute-bound
    return budget, mt_target


def _vmem_bytes(mt, th, D, out_itemsize, acc_in_output):
    """Working-set estimate incl. double-buffered blocks and in-kernel temps."""
    x_tile = 2 * mt * D * 2                       # bf16 x tile, double-buffered
    out_tile = 2 * mt * D * out_itemsize          # resident output tile
    w13_tile = 2 * (D * 2 * th) * 2               # packed [w1|w3] tile (bf16)
    w2_tile = 2 * (th * D) * 2                    # w2^T tile (bf16)
    acc = 0 if acc_in_output else mt * D * 4      # f32 accumulator scratch
    gv = mt * 2 * th * 4                          # fused projection result (f32)
    hblk = mt * th * 2                            # gated hidden block (bf16)
    silu_tmp = mt * th * 4                        # silu / gating temporaries (f32)
    internal = 2 << 20                            # Mosaic internal scratch slack
    return x_tile + out_tile + w13_tile + w2_tile + acc + gv + hblk + silu_tmp + internal


def _select_tiles(M, D, H, out_itemsize, acc_in_output, th_fixed=None):
    """Pick (mt, th) from the per-generation VMEM budget + roofline target."""
    budget, mt_target = _vmem_budget()

    def fits(mt, th):
        return _vmem_bytes(mt, th, D, out_itemsize, acc_in_output) <= budget

    # Token-tile cap: never larger than the (16-aligned) token count; when there
    # are enough tokens, keep at least 2 token tiles so the "parallel" axis can
    # split across the two v7x TensorCores.
    mt_cap = _round_up(max(M, 1), 16)
    if M >= 512:
        mt_cap = min(mt_cap, max(128, _round_up(-(-M // 2), 128)))
    mt_cands = sorted(
        {c for c in (1024, 768, 512, 384, 256, 192, 128, 96, 64, 48, 32, 16, mt_cap)
         if 16 <= c <= min(mt_target, mt_cap)},
        reverse=True)
    if not mt_cands:
        mt_cands = [16]

    if th_fixed is not None:
        for mt in mt_cands:
            if fits(mt, th_fixed):
                return mt, th_fixed, budget
        return 16, th_fixed, budget

    # Hidden-tile candidates: keep th >= 256 when possible (2x256x256 MXU on
    # v6e/v7x); 128 is a last resort.
    th_cands = [t for t in (1024, 896, 768, 640, 512, 384, 256, 128)
                if t <= H and H % t == 0]

    # Phase 1: full weight residency (nh == 1).  The weight block index never
    # changes across the grid, so Pallas DMAs the weights exactly once.
    if H % 128 == 0:
        for mt in mt_cands:
            if fits(mt, H):
                return mt, H, budget

    # Phase 2: maximize the token tile first (arithmetic intensity ~ mt flops
    # per streamed weight byte), then the largest hidden tile that fits.
    for mt in mt_cands:
        for th in th_cands:
            if fits(mt, th):
                return mt, th, budget

    # Phase 3: last resort (tiny tiles).
    return 16, (th_cands[-1] if th_cands else 128), budget


# --------------------------------------------------------------------------
# Wrapper: pack weights once, return a callable
# --------------------------------------------------------------------------
def make_feedforward(w1, w2, w3, *, out_dtype=None):
    """Pack the SwiGLU weights once and return fn(x) -> w2(silu(w1 x) * w3 x)."""
    H, D = w1.shape
    assert w3.shape == (H, D) and w2.shape == (D, H)
    # TODO(synk): pad/mask ragged feature dims; this version requires lane-aligned D/H.
    assert D % 128 == 0 and H % 128 == 0, "feature dims must be multiples of 128"

    # Hidden tile is fixed at pack time (conservative: f32 output + f32 scratch).
    _, th, _ = _select_tiles(1024, D, H, out_itemsize=4, acc_in_output=False)
    assert H % th == 0 and th % 128 == 0
    nh = H // th

    # ---- one-time weight packing (outside the per-call hot path) ----
    # Up/gate weights: (nh, D, 2*th) so each hidden tile is one fully
    # contiguous slab holding [w1 tile | w3 tile].
    w1t = jnp.transpose(w1).reshape(D, nh, th).transpose(1, 0, 2)   # (nh, D, th)
    w3t = jnp.transpose(w3).reshape(D, nh, th).transpose(1, 0, 2)   # (nh, D, th)
    w13 = jnp.concatenate([w1t, w3t], axis=2).astype(jnp.bfloat16)  # (nh, D, 2*th)
    # Down-projection stored as (H, D): a hidden tile is a contiguous row slab.
    w2t = jnp.transpose(w2).astype(jnp.bfloat16)                    # (H, D)
    w13 = jax.block_until_ready(w13)
    w2t = jax.block_until_ready(w2t)

    def apply(x):
        B, S, Dx = x.shape
        assert Dx == D
        od = x.dtype if out_dtype is None else out_dtype
        out_itemsize = jnp.dtype(od).itemsize
        acc_in_output = (od == jnp.float32)
        M = B * S

        mt, _, budget = _select_tiles(M, D, H, out_itemsize, acc_in_output,
                                      th_fixed=th)
        M_pad = _round_up(M, mt)
        nm = M_pad // mt

        x2 = x.reshape(M, D).astype(jnp.bfloat16)
        if M_pad != M:
            x2 = jnp.pad(x2, ((0, M_pad - M), (0, 0)))

        if acc_in_output:
            kernel = _swiglu_kernel_acc_out
            scratch_shapes = []
        else:
            kernel = _swiglu_kernel_scratch
            scratch_shapes = [pltpu.VMEM((mt, D), jnp.float32)]

        est = _vmem_bytes(mt, th, D, out_itemsize, acc_in_output)
        vmem_limit = int(min(max(est + (4 << 20), 32 << 20), budget))
        vmem_limit = max(vmem_limit, est)   # never request less than the working set

        out = pl.pallas_call(
            kernel,
            out_shape=jax.ShapeDtypeStruct((M_pad, D), od),
            grid_spec=pltpu.PrefetchScalarGridSpec(
                num_scalar_prefetch=0,
                grid=(nm, nh),                                      # reduction axis innermost
                in_specs=[
                    pl.BlockSpec((mt, D), lambda m, h: (m, 0)),     # x tile (resident over h)
                    pl.BlockSpec((None, D, 2 * th),
                                 lambda m, h: (h, 0, 0)),           # contiguous [w1|w3] slab
                    pl.BlockSpec((th, D), lambda m, h: (h, 0)),     # w2^T tile (contig rows)
                ],
                out_specs=pl.BlockSpec((mt, D), lambda m, h: (m, 0)),
                scratch_shapes=scratch_shapes,
            ),
            compiler_params=pltpu.CompilerParams(
                dimension_semantics=("parallel", "arbitrary"),
                vmem_limit_bytes=vmem_limit),
        )(x2, w13, w2t)

        if M_pad != M:
            out = out[:M]
        return out.reshape(B, S, D)

    return apply


def feedforward(x, w1, w2, w3):
    """Convenience one-shot wrapper (packs weights per call; prefer make_feedforward)."""
    return make_feedforward(w1, w2, w3, out_dtype=x.dtype)(x)


# --------------------------------------------------------------------------
# Demo / self-check
# --------------------------------------------------------------------------
class Args:
    # Small, TPU-tile-friendly shapes consistent with the module's formula.
    dim: int = 256
    multiple_of: int = 256
    ffn_dim_multiplier = None


def compute_hidden_dim(a):
    hidden_dim = 4 * a.dim
    hidden_dim = int(2 * hidden_dim / 3)
    if a.ffn_dim_multiplier is not None:
        hidden_dim = int(a.ffn_dim_multiplier * hidden_dim)
    hidden_dim = a.multiple_of * ((hidden_dim + a.multiple_of - 1) // a.multiple_of)
    return hidden_dim


if __name__ == "__main__":
    a = Args()
    D = a.dim
    H = compute_hidden_dim(a)          # 768 for dim=256, multiple_of=256
    B, S = 2, 8

    key = jax.random.PRNGKey(0)
    kx, k1, k2, k3 = jax.random.split(key, 4)

    x = jax.random.normal(kx, (B, S, D), dtype=jnp.float32)
    w1 = jax.random.normal(k1, (H, D), dtype=jnp.float32) / math.sqrt(D)
    w2 = jax.random.normal(k2, (D, H), dtype=jnp.float32) / math.sqrt(H)
    w3 = jax.random.normal(k3, (H, D), dtype=jnp.float32) / math.sqrt(D)

    ffn = make_feedforward(w1, w2, w3)         # weights packed once
    y = ffn(x)
    jax.block_until_ready(y)
    assert y.shape == (B, S, D) and y.dtype == x.dtype

    # Tight check against a reference using the same bf16 MXU-input precision.
    xb = x.reshape(-1, D).astype(jnp.bfloat16)
    g = jnp.dot(xb, w1.T.astype(jnp.bfloat16), preferred_element_type=jnp.float32)
    v = jnp.dot(xb, w3.T.astype(jnp.bfloat16), preferred_element_type=jnp.float32)
    hb = (jax.nn.silu(g) * v).astype(jnp.bfloat16)
    ref_bf16 = jnp.dot(hb, w2.T.astype(jnp.bfloat16),
                       preferred_element_type=jnp.float32).reshape(B, S, D)
    assert jnp.allclose(y, ref_bf16, atol=2e-3, rtol=2e-3), "mismatch vs bf16-matched ref"

    # Loose check against the full-f32 module semantics (bf16 MXU inputs expected).
    ref_f32 = (jax.nn.silu(x @ w1.T) * (x @ w3.T)) @ w2.T
    assert jnp.allclose(y, ref_f32, atol=6e-2, rtol=6e-2), "mismatch vs f32 reference"

    print("KERNEL_OK")
</pallas_src>

<mosaic_0001>
module attributes {stable_mosaic.version = 11 : i64} {
  func.func @_swiglu_kernel_acc_out(%arg0: i32, %arg1: i32, %arg2: memref<16x256xbf16, #tpu.memory_space<vmem>>, %arg3: memref<1x256x1536xbf16, #tpu.memory_space<vmem>>, %arg4: memref<768x256xbf16, #tpu.memory_space<vmem>>, %arg5: memref<16x256xf32, #tpu.memory_space<vmem>>) attributes {dimension_semantics = [#tpu.dimension_semantics<parallel>, #tpu.dimension_semantics<arbitrary>], iteration_bounds = array<i64: 1, 1>, scalar_prefetch = 0 : i64, scratch_operands = 0 : i64, tpu.core_type = #tpu.core_type<tc>, window_params = [{transform_indices = @transform_0, window_bounds = array<i64: 16, 256>}, {transform_indices = @transform_1, window_bounds = array<i64: 1, 256, 1536>}, {transform_indices = @transform_2, window_bounds = array<i64: 768, 256>}, {transform_indices = @transform_3, window_bounds = array<i64: 16, 256>}]} {
    %c0_i32 = arith.constant 0 : i32
    %0 = arith.cmpi eq, %arg1, %c0_i32 : i32
    %1 = arith.extui %0 : i1 to i32
    %c0_i32_0 = arith.constant 0 : i32
    %2 = arith.cmpi ne, %1, %c0_i32_0 : i32
    scf.if %2 {
      %cst_13 = arith.constant 0.000000e+00 : f32
      %22 = vector.broadcast %cst_13 : f32 to vector<16x256xf32>
      %c0_14 = arith.constant 0 : index
      %c0_15 = arith.constant 0 : index
      %23 = vector.load %arg5[%c0_14, %c0_15] : memref<16x256xf32, #tpu.memory_space<vmem>>, vector<16x256xf32>
      tpu.vector_store %arg5[%c0_14, %c0_15], %22 {strides = array<i32>} : memref<16x256xf32, #tpu.memory_space<vmem>>, vector<16x256xf32>,
    } else {
    }
    %c0 = arith.constant 0 : index
    %c0_1 = arith.constant 0 : index
    %3 = vector.load %arg2[%c0, %c0_1] : memref<16x256xbf16, #tpu.memory_space<vmem>>, vector<16x256xbf16>
    %c0_2 = arith.constant 0 : index
    %c0_3 = arith.constant 0 : index
    %c0_4 = arith.constant 0 : index
    %4 = vector.load %arg3[%c0_2, %c0_3, %c0_4] : memref<1x256x1536xbf16, #tpu.memory_space<vmem>>, vector<1x256x1536xbf16>
    %5 = vector.shape_cast %4 : vector<1x256x1536xbf16> to vector<256x1536xbf16>
    %cst = arith.constant dense<0.000000e+00> : vector<16x1536xf32>
    %6 = tpu.matmul %3, %5, %cst {dimension_numbers = #tpu.dot_dimension_numbers<[1], [0], [0], [1], [0, 0, 1, 1], [], []>} : vector<16x256xbf16>, vector<256x1536xbf16>, vector<16x1536xf32> -> vector<16x1536xf32>
    %7 = vector.extract_strided_slice %6 {offsets = [0, 0], sizes = [16, 768], strides = [1, 1]} : vector<16x1536xf32> to vector<16x768xf32>
    %8 = vector.extract_strided_slice %6 {offsets = [0, 768], sizes = [16, 768], strides = [1, 1]} : vector<16x1536xf32> to vector<16x768xf32>
    %9 = arith.negf %7 : vector<16x768xf32>
    %10 = math.exp %9 : vector<16x768xf32>
    %cst_5 = arith.constant 1.000000e+00 : f32
    %11 = vector.broadcast %cst_5 : f32 to vector<16x768xf32>
    %12 = arith.addf %11, %10 : vector<16x768xf32>
    %13 = arith.divf %11, %12 : vector<16x768xf32>
    %14 = arith.mulf %7, %13 : vector<16x768xf32>
    %15 = arith.mulf %14, %8 : vector<16x768xf32>
    %16 = arith.truncf %15 : vector<16x768xf32> to vector<16x768xbf16>
    %c0_6 = arith.constant 0 : index
    %c0_7 = arith.constant 0 : index
    %17 = vector.load %arg5[%c0_6, %c0_7] : memref<16x256xf32, #tpu.memory_space<vmem>>, vector<16x256xf32>
    %c0_8 = arith.constant 0 : index
    %c0_9 = arith.constant 0 : index
    %18 = vector.load %arg4[%c0_8, %c0_9] : memref<768x256xbf16, #tpu.memory_space<vmem>>, vector<768x256xbf16>
    %cst_10 = arith.constant dense<0.000000e+00> : vector<16x256xf32>
    %19 = tpu.matmul %16, %18, %cst_10 {dimension_numbers = #tpu.dot_dimension_numbers<[1], [0], [0], [1], [0, 0, 1, 1], [], []>} : vector<16x768xbf16>, vector<768x256xbf16>, vector<16x256xf32> -> vector<16x256xf32>
    %20 = arith.addf %17, %19 : vector<16x256xf32>
    %c0_11 = arith.constant 0 : index
    %c0_12 = arith.constant 0 : index
    %21 = vector.load %arg5[%c0_11, %c0_12] : memref<16x256xf32, #tpu.memory_space<vmem>>, vector<16x256xf32>
    tpu.vector_store %arg5[%c0_11, %c0_12], %20 {strides = array<i32>} : memref<16x256xf32, #tpu.memory_space<vmem>>, vector<16x256xf32>,
    return
  }
  func.func @transform_0(%arg0: i32, %arg1: i32) -> (i32, i32) {
    %c0_i32 = arith.constant 0 : i32
    %c0_i32_0 = arith.constant 0 : i32
    return %arg0, %c0_i32 : i32, i32
  }
  func.func @transform_1(%arg0: i32, %arg1: i32) -> (i32, i32, i32) {
    %c0_i32 = arith.constant 0 : i32
    %c0_i32_0 = arith.constant 0 : i32
    %c0_i32_1 = arith.constant 0 : i32
    return %arg1, %c0_i32, %c0_i32_0 : i32, i32, i32
  }
  func.func @transform_2(%arg0: i32, %arg1: i32) -> (i32, i32) {
    %c0_i32 = arith.constant 0 : i32
    %c0_i32_0 = arith.constant 0 : i32
    return %arg1, %c0_i32 : i32, i32
  }
  func.func @transform_3(%arg0: i32, %arg1: i32) -> (i32, i32) {
    %c0_i32 = arith.constant 0 : i32
    %c0_i32_0 = arith.constant 0 : i32
    return %arg0, %c0_i32 : i32, i32
  }
}

</mosaic_0001>

<bundles_post_ra>
// kernel: tpu_custom_call.1
= control target key start
LH: loop header
LB: loop body
LE: loop exit
PB: predicated region body
PF: predicated region fallthrough
CT: control target
= control target key end

     0   :  { %8 = vsyncpa [#allocation3], 0  ;;  %s3295_s0 = inlined_call_operand.hbm [shape: bf16[16,256], index: 0, kind: input, shape index: {}]   ;;  %s3296_s1 = inlined_call_operand.hbm [shape: bf16[1,256,1536], index: 1, kind: input, shape index: {}]   ;;  %s3297_s2 = inlined_call_operand.hbm [shape: bf16[768,256], index: 2, kind: input, shape index: {}]   ;;  %s3298_s3 = inlined_call_operand.hbm [shape: f32[16,256], index: 3, kind: output, shape index: {}]  }
   0x1   :  { %9 = vsyncpa [#allocation6], 0 }
   0x2   :  { %10 = vsyncpa [#allocation4], 0  ;;  %s3205_s12 = smov [#allocation5]  }
   0x3   :  { %s28_s13 = sshll.u32 %s3205_s12, 4  ;;  %s29_s13 = int_to_ptr.vmem [resolvable:$true] %s28_s13 }
   0x4   :  { %s3127_s14 = scalar_lea.vmem %s29_s13, 24576  ;;  %p3132_p1 = scmp.lt.s32.totalorder %s29_s13, %s29_s13 }
   0x5   :  { %p3128_p0 = scmp.ne.s32.totalorder %s29_s13, %s3127_s14  ;;  %p3133_p2 = scmp.lt.s32.totalorder %s3127_s14, %s3127_s14 }
   0x7   :  { %p3134_p3 = por %p3133_p2, %p3132_p1 }
   0x9   :  { %p3135_p4 = pnand %p3134_p3, %p3128_p0 }
   0xb   :  { %3138 = shalt.err (!%p3135_p4)
}
   0xc   :  { %s3206_s15 = smov 768   ;;  %s3207_s16 = smov 48  }
   0xd   :  { %34 = dma.hbm_to_vmem [thread:$0]  %s3296_s1, 24576, %s29_s13, [#allocation6], %s3206_s15, %s3206_s15, %s3207_s16  }
   0xe   :  { %s3208_s19 = smov [#allocation2]  }
   0xf   :  { %s16_s20 = sshll.u32 %s3208_s19, 4  ;;  %s17_s20 = int_to_ptr.vmem [resolvable:$true] %s16_s20 }
  0x10   :  { %s3147_s21 = scalar_lea.vmem %s17_s20, 256  ;;  %p3152_p6 = scmp.lt.s32.totalorder %s17_s20, %s17_s20 }
  0x11   :  { %p3148_p5 = scmp.ne.s32.totalorder %s17_s20, %s3147_s21  ;;  %p3153_p7 = scmp.lt.s32.totalorder %s3147_s21, %s3147_s21 }
  0x13   :  { %p3154_p8 = por %p3153_p7, %p3152_p6 }
  0x15   :  { %p3155_p9 = pnand %p3154_p8, %p3148_p5 }
  0x17   :  { %3158 = shalt.err (!%p3155_p9)
}
  0x18   :  { %s3209_s22 = smov 128   ;;  %s3210_s23 = smov 8  }
  0x19   :  { %22 = dma.hbm_to_vmem [thread:$0]  %s3295_s0, 256, %s17_s20, [#allocation3], %s3209_s22, %s3209_s22, %s3210_s23  }
  0x1a   :  { %s3211_s26 = smov [#allocation7]  }
  0x1b   :  { %s40_s27 = sshll.u32 %s3211_s26, 4  ;;  %s41_s27 = int_to_ptr.vmem [resolvable:$true] %s40_s27 }
  0x1c   :  { %s3167_s1 = scalar_lea.vmem %s41_s27, 12288  ;;  %p3172_p11 = scmp.lt.s32.totalorder %s41_s27, %s41_s27 }
  0x1d   :  { %p3168_p10 = scmp.ne.s32.totalorder %s41_s27, %s3167_s1  ;;  %p3173_p12 = scmp.lt.s32.totalorder %s3167_s1, %s3167_s1 }
  0x1f   :  { %p3174_p13 = por %p3173_p12, %p3172_p11 }
  0x21   :  { %p3175_p0 = pnand %p3174_p13, %p3168_p10 }
  0x23   :  { %3178 = shalt.err (!%p3175_p0)
}
  0x24   :  { %46 = dma.hbm_to_vmem [thread:$0]  %s3297_s2, 12288, %s41_s27, [#allocation6], %s3209_s22, %s3209_s22, %s3210_s23  }
  0x25   :  { %3199 = dma.done.wait [#allocation3], 256  }
  0x26   :  { %3200 = vsyncadd [#allocation3], 4294967040 }
  0x27   :  { %3201 = dma.done.wait [#allocation6], 36864  }
  0x28   :  { %3202 = vsyncadd [#allocation6], 4294930432  ;;  %v2636_v0 = vld [vmem:[#allocation5 + $0x2a4] ss:$48 sps:$4 sm:$0xff]   ;;  %v2638_v1 = vld [vmem:[#allocation5 + $0x2ac] ss:$48 sps:$4 sm:$0xff]  }
  0x29   :  { %1228 = vmatprep.subr.bf16.mxu0 %v2636_v0  ;;  %v2640_v2 = vld [vmem:[#allocation5 + $0x2a0] ss:$48 sps:$4 sm:$0xff]   ;;  %v2641_v3 = vld [vmem:[#allocation5 + $0x2a8] ss:$48 sps:$4 sm:$0xff]   ;;  %1271 = vmatprep.subr.bf16.mxu1 %v2638_v1  ;;  %v2642_v4 = vld [vmem:[#allocation5 + $0x244] ss:$48 sps:$4 sm:$0xff]  }
  0x2a   :  { %1229 = vmatpush1.bf16.msra.mxu0 %v2640_v2  ;;  %1272 = vmatpush1.bf16.msra.mxu1 %v2641_v3  ;;  %v2644_v5 = vld [vmem:[#allocation5 + $0x24c] ss:$48 sps:$4 sm:$0xff]   ;;  %v2646_v6 = vld [vmem:[#allocation5 + $0x240] ss:$48 sps:$4 sm:$0xff]   ;;  %v2647_v7 = vld [vmem:[#allocation5 + $0x248] ss:$48 sps:$4 sm:$0xff]  }
  0x2b   :  { %1230 = vmatprep.subr.bf16.mxu0 %v2642_v4  ;;  %1273 = vmatprep.subr.bf16.mxu1 %v2644_v5  ;;  %v2648_v8 = vld [vmem:[#allocation5 + $0x1e4] ss:$48 sps:$4 sm:$0xff]   ;;  %v2650_v9 = vld [vmem:[#allocation5 + $0x1ec] ss:$48 sps:$4 sm:$0xff]   ;;  %v2652_v10 = vld [vmem:[#allocation5 + $0x1e0] ss:$48 sps:$4 sm:$0xff]  }
  0x2c   :  { %v2653_v11 = vld [vmem:[#allocation5 + $0x1e8] ss:$48 sps:$4 sm:$0xff]   ;;  %v2654_v12 = vld [vmem:[#allocation5 + $0x184] ss:$48 sps:$4 sm:$0xff]   ;;  %v2656_v13 = vld [vmem:[#allocation5 + $0x18c] ss:$48 sps:$4 sm:$0xff]  }
  0x2d   :  { %v2658_v14 = vld [vmem:[#allocation5 + $0x180] ss:$48 sps:$4 sm:$0xff]   ;;  %v2659_v15 = vld [vmem:[#allocation5 + $0x188] ss:$48 sps:$4 sm:$0xff]   ;;  %v2660_v16 = vld [vmem:[#allocation5 + $0x124] ss:$48 sps:$4 sm:$0xff]  }
  0x2e   :  { %1231 = vmatpush1.bf16.msra.mxu0 %v2646_v6  ;;  %1274 = vmatpush1.bf16.msra.mxu1 %v2647_v7  ;;  %v2662_v17 = vld [vmem:[#allocation5 + $0x12c] ss:$48 sps:$4 sm:$0xff]   ;;  %v2664_v18 = vld [vmem:[#allocation5 + $0x120] ss:$48 sps:$4 sm:$0xff]   ;;  %v2665_v19 = vld [vmem:[#allocation5 + $0x128] ss:$48 sps:$4 sm:$0xff]  }
  0x2f   :  { %1232 = vmatprep.subr.bf16.mxu0 %v2648_v8  ;;  %1275 = vmatprep.subr.bf16.mxu1 %v2650_v9  ;;  %v2666_v20 = vld [vmem:[#allocation5 + $0xc4] ss:$48 sps:$4 sm:$0xff]   ;;  %v2668_v21 = vld [vmem:[#allocation5 + $0xcc] ss:$48 sps:$4 sm:$0xff]   ;;  %v2670_v22 = vld [vmem:[#allocation5 + $0xc0] ss:$48 sps:$4 sm:$0xff]  }
  0x30   :  { %v2671_v23 = vld [vmem:[#allocation5 + $0xc8] ss:$48 sps:$4 sm:$0xff]   ;;  %v2672_v24 = vld [vmem:[#allocation5 + $0x64] ss:$48 sps:$4 sm:$0xff]   ;;  %v2674_v25 = vld [vmem:[#allocation5 + $0x6c] ss:$48 sps:$4 sm:$0xff]  }
  0x31   :  { %v2676_v26 = vld [vmem:[#allocation5 + $0x60] ss:$48 sps:$4 sm:$0xff]   ;;  %v2677_v27 = vld [vmem:[#allocation5 + $0x68] ss:$48 sps:$4 sm:$0xff]   ;;  %v2678_v28 = vld [vmem:[#allocation5 + $0x4] ss:$48 sps:$4 sm:$0xff]  }
  0x32   :  { %1233 = vmatpush1.bf16.msra.mxu0 %v2652_v10  ;;  %1276 = vmatpush1.bf16.msra.mxu1 %v2653_v11  ;;  %v2680_v29 = vld [vmem:[#allocation5 + $0xc] ss:$48 sps:$4 sm:$0xff]   ;;  %v2682_v30 = vld [vmem:[#allocation5] ss:$48 sps:$4 sm:$0xff]   ;;  %v2683_v31 = vld [vmem:[#allocation5 + $0x8] ss:$48 sps:$4 sm:$0xff]  }
  0x33   :  { %1234 = vmatprep.subr.bf16.mxu0 %v2654_v12  ;;  %1277 = vmatprep.subr.bf16.mxu1 %v2656_v13  ;;  %v2684_v32 = vld [vmem:[#allocation5 + $0x5a4] ss:$48 sps:$4 sm:$0xff]   ;;  %v2686_v33 = vld [vmem:[#allocation5 + $0x5ac] ss:$48 sps:$4 sm:$0xff]   ;;  %v2688_v34 = vld [vmem:[#allocation5 + $0x5a0] ss:$48 sps:$4 sm:$0xff]  }
  0x34   :  { %v2689_v35 = vld [vmem:[#allocation5 + $0x5a8] ss:$48 sps:$4 sm:$0xff]   ;;  %v2690_v36 = vld [vmem:[#allocation5 + $0x544] ss:$48 sps:$4 sm:$0xff]   ;;  %v2692_v37 = vld [vmem:[#allocation5 + $0x54c] ss:$48 sps:$4 sm:$0xff]  }
  0x35   :  { %v2694_v38 = vld [vmem:[#allocation5 + $0x540] ss:$48 sps:$4 sm:$0xff]   ;;  %v2695_v39 = vld [vmem:[#allocation5 + $0x548] ss:$48 sps:$4 sm:$0xff]   ;;  %v2696_v40 = vld [vmem:[#allocation5 + $0x4e4] ss:$48 sps:$4 sm:$0xff]  }
  0x36   :  { %1235 = vmatpush1.bf16.msra.mxu0 %v2658_v14  ;;  %1278 = vmatpush1.bf16.msra.mxu1 %v2659_v15  ;;  %v2698_v41 = vld [vmem:[#allocation5 + $0x4ec] ss:$48 sps:$4 sm:$0xff]   ;;  %v2700_v42 = vld [vmem:[#allocation5 + $0x4e0] ss:$48 sps:$4 sm:$0xff]   ;;  %v2701_v43 = vld [vmem:[#allocation5 + $0x4e8] ss:$48 sps:$4 sm:$0xff]  }
  0x37   :  { %1236 = vmatprep.subr.bf16.mxu0 %v2660_v16  ;;  %1279 = vmatprep.subr.bf16.mxu1 %v2662_v17  ;;  %v2702_v44 = vld [vmem:[#allocation5 + $0x484] ss:$48 sps:$4 sm:$0xff]   ;;  %v2704_v45 = vld [vmem:[#allocation5 + $0x48c] ss:$48 sps:$4 sm:$0xff]   ;;  %v2706_v46 = vld [vmem:[#allocation5 + $0x480] ss:$48 sps:$4 sm:$0xff]  }
  0x38   :  { %v2707_v47 = vld [vmem:[#allocation5 + $0x488] ss:$48 sps:$4 sm:$0xff]   ;;  %v3244_v48 = vld [vmem:[#allocation2 + $0x4] ss:$8 sps:$4 sm:$0xff]   ;;  %v2712_v51 = vld [vmem:[#allocation5 + $0x420] ss:$48 sps:$4 sm:$0xff]  }
  0x39   :  { %v2708_v49 = vld [vmem:[#allocation5 + $0x424] ss:$48 sps:$4 sm:$0xff]   ;;  %v2710_v50 = vld [vmem:[#allocation5 + $0x42c] ss:$48 sps:$4 sm:$0xff]   ;;  %1260 = vmatprep.mubr.bf16.mxu0 %v3244_v48  ;;  %1303 = vmatprep.mubr.bf16.mxu1 %v3244_v48  ;;  %v2713_v52 = vld [vmem:[#allocation5 + $0x428] ss:$48 sps:$4 sm:$0xff]  }
  0x3a   :  { %1237 = vmatpush1.bf16.msra.mxu0 %v2664_v18  ;;  %1280 = vmatpush1.bf16.msra.mxu1 %v2665_v19  ;;  %v2714_v53 = vld [vmem:[#allocation5 + $0x3c4] ss:$48 sps:$4 sm:$0xff]   ;;  %v2716_v54 = vld [vmem:[#allocation5 + $0x3cc] ss:$48 sps:$4 sm:$0xff]   ;;  %v2718_v55 = vld [vmem:[#allocation5 + $0x3c0] ss:$48 sps:$4 sm:$0xff]  }
  0x3b   :  { %1238 = vmatprep.subr.bf16.mxu0 %v2666_v20  ;;  %1281 = vmatprep.subr.bf16.mxu1 %v2668_v21  ;;  %v2719_v56 = vld [vmem:[#allocation5 + $0x3c8] ss:$48 sps:$4 sm:$0xff]   ;;  %v2720_v57 = vld [vmem:[#allocation5 + $0x364] ss:$48 sps:$4 sm:$0xff]   ;;  %v2722_v58 = vld [vmem:[#allocation5 + $0x36c] ss:$48 sps:$4 sm:$0xff]  }
  0x3c   :  { %v2724_v59 = vld [vmem:[#allocation5 + $0x360] ss:$48 sps:$4 sm:$0xff]   ;;  %v2725_v60 = vld [vmem:[#allocation5 + $0x368] ss:$48 sps:$4 sm:$0xff]   ;;  %v2726_v61 = vld [vmem:[#allocation5 + $0x304] ss:$48 sps:$4 sm:$0xff]  }
  0x3d   :  { %v2728_v62 = vld [vmem:[#allocation5 + $0x30c] ss:$48 sps:$4 sm:$0xff]   ;;  %v2730_v63 = vld [vmem:[#allocation5 + $0x300] ss:$48 sps:$4 sm:$0xff]   ;;  %v2731_v0 = vld [vmem:[#allocation5 + $0x308] ss:$48 sps:$4 sm:$0xff]  }
  0x3e   :  { %1239 = vmatpush1.bf16.msra.mxu0 %v2670_v22  ;;  %1282 = vmatpush1.bf16.msra.mxu1 %v2671_v23  ;;  %v2737_v1 = vld [vmem:[#allocation5 + $0x2b4] ss:$48 sps:$4 sm:$0xff]   ;;  %v2740_v2 = vld [vmem:[#allocation5 + $0x2bc] ss:$48 sps:$4 sm:$0xff]   ;;  %v3248_v3 = vld [vmem:[#allocation2] ss:$8 sps:$4 sm:$0xff]  }
  0x3f   :  { %1240 = vmatprep.subr.bf16.mxu0 %v2672_v24  ;;  %1283 = vmatprep.subr.bf16.mxu1 %v2674_v25  ;;  %v2735_v4 = vld [vmem:[#allocation5 + $0x2b0] ss:$48 sps:$4 sm:$0xff]   ;;  %v2738_v5 = vld [vmem:[#allocation5 + $0x2b8] ss:$48 sps:$4 sm:$0xff]   ;;  %v2743_v6 = vld [vmem:[#allocation5 + $0x254] ss:$48 sps:$4 sm:$0xff]  }
  0x40   :  { %v2746_v7 = vld [vmem:[#allocation5 + $0x25c] ss:$48 sps:$4 sm:$0xff]   ;;  %v2741_v8 = vld [vmem:[#allocation5 + $0x250] ss:$48 sps:$4 sm:$0xff]   ;;  %v2744_v9 = vld [vmem:[#allocation5 + $0x258] ss:$48 sps:$4 sm:$0xff]  }
  0x41   :  { %v2749_v10 = vld [vmem:[#allocation5 + $0x1f4] ss:$48 sps:$4 sm:$0xff]   ;;  %v2752_v11 = vld [vmem:[#allocation5 + $0x1fc] ss:$48 sps:$4 sm:$0xff]   ;;  %v2747_v12 = vld [vmem:[#allocation5 + $0x1f0] ss:$48 sps:$4 sm:$0xff]  }
  0x42   :  { %1241 = vmatpush1.bf16.msra.mxu0 %v2676_v26  ;;  %1284 = vmatpush1.bf16.msra.mxu1 %v2677_v27  ;;  %v2750_v13 = vld [vmem:[#allocation5 + $0x1f8] ss:$48 sps:$4 sm:$0xff]   ;;  %v2755_v14 = vld [vmem:[#allocation5 + $0x194] ss:$48 sps:$4 sm:$0xff]   ;;  %v2758_v15 = vld [vmem:[#allocation5 + $0x19c] ss:$48 sps:$4 sm:$0xff]  }
  0x43   :  { %1242 = vmatprep.subr.bf16.mxu0 %v2678_v28  ;;  %1285 = vmatprep.subr.bf16.mxu1 %v2680_v29  ;;  %v2753_v16 = vld [vmem:[#allocation5 + $0x190] ss:$48 sps:$4 sm:$0xff]   ;;  %v2756_v17 = vld [vmem:[#allocation5 + $0x198] ss:$48 sps:$4 sm:$0xff]   ;;  %v2761_v18 = vld [vmem:[#allocation5 + $0x134] ss:$48 sps:$4 sm:$0xff]  }
  0x44   :  { %v2764_v19 = vld [vmem:[#allocation5 + $0x13c] ss:$48 sps:$4 sm:$0xff]   ;;  %v2759_v20 = vld [vmem:[#allocation5 + $0x130] ss:$48 sps:$4 sm:$0xff]   ;;  %v2762_v21 = vld [vmem:[#allocation5 + $0x138] ss:$48 sps:$4 sm:$0xff]  }
  0x45   :  { %v2767_v22 = vld [vmem:[#allocation5 + $0xd4] ss:$48 sps:$4 sm:$0xff]   ;;  %v2770_v23 = vld [vmem:[#allocation5 + $0xdc] ss:$48 sps:$4 sm:$0xff]   ;;  %v2765_v24 = vld [vmem:[#allocation5 + $0xd0] ss:$48 sps:$4 sm:$0xff]  }
  0x46   :  { %1243 = vmatpush1.bf16.msra.mxu0 %v2682_v30  ;;  %1286 = vmatpush1.bf16.msra.mxu1 %v2683_v31  ;;  %v2768_v25 = vld [vmem:[#allocation5 + $0xd8] ss:$48 sps:$4 sm:$0xff]   ;;  %v2773_v26 = vld [vmem:[#allocation5 + $0x74] ss:$48 sps:$4 sm:$0xff]   ;;  %v2776_v27 = vld [vmem:[#allocation5 + $0x7c] ss:$48 sps:$4 sm:$0xff]  }
  0x47   :  { %1244 = vmatprep.subr.bf16.mxu0 %v2684_v32  ;;  %1287 = vmatprep.subr.bf16.mxu1 %v2686_v33  ;;  %v2771_v28 = vld [vmem:[#allocation5 + $0x70] ss:$48 sps:$4 sm:$0xff]   ;;  %v2774_v29 = vld [vmem:[#allocation5 + $0x78] ss:$48 sps:$4 sm:$0xff]   ;;  %v2779_v30 = vld [vmem:[#allocation5 + $0x14] ss:$48 sps:$4 sm:$0xff]  }
  0x48   :  { %v2782_v31 = vld [vmem:[#allocation5 + $0x1c] ss:$48 sps:$4 sm:$0xff]   ;;  %v2777_v32 = vld [vmem:[#allocation5 + $0x10] ss:$48 sps:$4 sm:$0xff]   ;;  %v2780_v33 = vld [vmem:[#allocation5 + $0x18] ss:$48 sps:$4 sm:$0xff]  }
  0x49   :  { %s3212_s0 = smov [#allocation8]  }
  0x4a   :  { %1245 = vmatpush2.bf16.msra.mxu0 %v2688_v34  ;;  %1288 = vmatpush2.bf16.msra.mxu1 %v2689_v35  ;;  %v2785_v34 = vld [vmem:[#allocation5 + $0x5b4] ss:$48 sps:$4 sm:$0xff]   ;;  %v2788_v35 = vld [vmem:[#allocation5 + $0x5bc] ss:$48 sps:$4 sm:$0xff]   ;;  %s2310_s2 = sshll.u32 %s3212_s0, 4  ;;  %s2311_s2 = int_to_ptr.vmem [resolvable:$true] %s2310_s2 }
  0x4b   :  { %1246 = vmatprep.subr.bf16.mxu0 %v2690_v36  ;;  %1289 = vmatprep.subr.bf16.mxu1 %v2692_v37  ;;  %v2783_v36 = vld [vmem:[#allocation5 + $0x5b0] ss:$48 sps:$4 sm:$0xff]   ;;  %v2786_v37 = vld [vmem:[#allocation5 + $0x5b8] ss:$48 sps:$4 sm:$0xff]   ;;  %s3179_s30 = scalar_lea.vmem %s2311_s2, 512  ;;  %p3184_p2 = scmp.lt.s32.totalorder %s2311_s2, %s2311_s2 }
  0x4c   :  { %p3180_p1 = scmp.ne.s32.totalorder %s2311_s2, %s3179_s30  ;;  %p3185_p3 = scmp.lt.s32.totalorder %s3179_s30, %s3179_s30 }
  0x4e   :  { %1247 = vmatpush2.bf16.msra.mxu0 %v2694_v38  ;;  %1290 = vmatpush2.bf16.msra.mxu1 %v2695_v39  ;;  %v2791_v38 = vld [vmem:[#allocation5 + $0x554] ss:$48 sps:$4 sm:$0xff]   ;;  %v2794_v39 = vld [vmem:[#allocation5 + $0x55c] ss:$48 sps:$4 sm:$0xff]   ;;  %p3186_p4 = por %p3185_p3, %p3184_p2 }
  0x4f   :  { %1248 = vmatprep.subr.bf16.mxu0 %v2696_v40  ;;  %1291 = vmatprep.subr.bf16.mxu1 %v2698_v41  ;;  %v2789_v40 = vld [vmem:[#allocation5 + $0x550] ss:$48 sps:$4 sm:$0xff]   ;;  %v2792_v41 = vld [vmem:[#allocation5 + $0x558] ss:$48 sps:$4 sm:$0xff]  }
  0x50   :  { %p3187_p5 = pnand %p3186_p4, %p3180_p1 }
  0x52   :  { %1249 = vmatpush2.bf16.msra.mxu0 %v2700_v42  ;;  %1292 = vmatpush2.bf16.msra.mxu1 %v2701_v43  ;;  %v2797_v42 = vld [vmem:[#allocation5 + $0x4f4] ss:$48 sps:$4 sm:$0xff]   ;;  %v2800_v43 = vld [vmem:[#allocation5 + $0x4fc] ss:$48 sps:$4 sm:$0xff]  }
  0x53   :  { %1250 = vmatprep.subr.bf16.mxu0 %v2702_v44  ;;  %1293 = vmatprep.subr.bf16.mxu1 %v2704_v45  ;;  %v2795_v44 = vld [vmem:[#allocation5 + $0x4f0] ss:$48 sps:$4 sm:$0xff]   ;;  %v2798_v45 = vld [vmem:[#allocation5 + $0x4f8] ss:$48 sps:$4 sm:$0xff]  }
  0x56   :  { %1251 = vmatpush2.bf16.msra.mxu0 %v2706_v46  ;;  %1294 = vmatpush2.bf16.msra.mxu1 %v2707_v47  ;;  %v2803_v46 = vld [vmem:[#allocation5 + $0x494] ss:$48 sps:$4 sm:$0xff]   ;;  %v2806_v47 = vld [vmem:[#allocation5 + $0x49c] ss:$48 sps:$4 sm:$0xff]  }
  0x57   :  { %1252 = vmatprep.subr.bf16.mxu0 %v2708_v49  ;;  %1295 = vmatprep.subr.bf16.mxu1 %v2710_v50  ;;  %v2801_v49 = vld [vmem:[#allocation5 + $0x490] ss:$48 sps:$4 sm:$0xff]   ;;  %v2804_v50 = vld [vmem:[#allocation5 + $0x498] ss:$48 sps:$4 sm:$0xff]  }
  0x5a   :  { %1253 = vmatpush2.bf16.msra.mxu0 %v2712_v51  ;;  %1296 = vmatpush2.bf16.msra.mxu1 %v2713_v52  ;;  %v2809_v51 = vld [vmem:[#allocation5 + $0x434] ss:$48 sps:$4 sm:$0xff]   ;;  %v2812_v52 = vld [vmem:[#allocation5 + $0x43c] ss:$48 sps:$4 sm:$0xff]  }
  0x5b   :  { %1254 = vmatprep.subr.bf16.mxu0 %v2714_v53  ;;  %1297 = vmatprep.subr.bf16.mxu1 %v2716_v54  ;;  %v2807_v53 = vld [vmem:[#allocation5 + $0x430] ss:$48 sps:$4 sm:$0xff]   ;;  %v2810_v54 = vld [vmem:[#allocation5 + $0x438] ss:$48 sps:$4 sm:$0xff]  }
  0x5e   :  { %1255 = vmatpush2.bf16.msra.mxu0 %v2718_v55  ;;  %1298 = vmatpush2.bf16.msra.mxu1 %v2719_v56  ;;  %v2815_v55 = vld [vmem:[#allocation5 + $0x3d4] ss:$48 sps:$4 sm:$0xff]   ;;  %v2818_v56 = vld [vmem:[#allocation5 + $0x3dc] ss:$48 sps:$4 sm:$0xff]  }
  0x5f   :  { %1256 = vmatprep.subr.bf16.mxu0 %v2720_v57  ;;  %1299 = vmatprep.subr.bf16.mxu1 %v2722_v58  ;;  %v2813_v57 = vld [vmem:[#allocation5 + $0x3d0] ss:$48 sps:$4 sm:$0xff]   ;;  %v2816_v58 = vld [vmem:[#allocation5 + $0x3d8] ss:$48 sps:$4 sm:$0xff]  }
  0x62   :  { %1257 = vmatpush2.bf16.msra.mxu0 %v2724_v59  ;;  %1300 = vmatpush2.bf16.msra.mxu1 %v2725_v60  ;;  %v2821_v59 = vld [vmem:[#allocation5 + $0x374] ss:$48 sps:$4 sm:$0xff]   ;;  %v2824_v60 = vld [vmem:[#allocation5 + $0x37c] ss:$48 sps:$4 sm:$0xff]  }
  0x63   :  { %1258 = vmatprep.subr.bf16.mxu0 %v2726_v61  ;;  %1301 = vmatprep.subr.bf16.mxu1 %v2728_v62  ;;  %v2819_v61 = vld [vmem:[#allocation5 + $0x370] ss:$48 sps:$4 sm:$0xff]   ;;  %v2822_v62 = vld [vmem:[#allocation5 + $0x378] ss:$48 sps:$4 sm:$0xff]  }
  0x66   :  { %1259 = vmatpush2.bf16.msra.mxu0 %v2730_v63  ;;  %1302 = vmatpush2.bf16.msra.mxu1 %v2731_v0  ;;  %v2827_v63 = vld [vmem:[#allocation5 + $0x314] ss:$48 sps:$4 sm:$0xff]   ;;  %v2830_v0 = vld [vmem:[#allocation5 + $0x31c] ss:$48 sps:$4 sm:$0xff]  }
  0x67   :  { %1314 = vmatprep.subr.bf16.mxu0 %v2737_v1  ;;  %1357 = vmatprep.subr.bf16.mxu1 %v2740_v2  ;;  %v2825_v1 = vld [vmem:[#allocation5 + $0x310] ss:$48 sps:$4 sm:$0xff]   ;;  %v2828_v2 = vld [vmem:[#allocation5 + $0x318] ss:$48 sps:$4 sm:$0xff]  }
  0x69   :  { %1261 = vmatmul.mubr.bf16.vlgmr.msra.gmra.mxu0 %v3248_v3  ;;  %1304 = vmatmul.mubr.bf16.vlgmr.msra.gmra.mxu1 %v3248_v3 }
  0x6a   :  { %1315 = vmatpush1.bf16.msra.mxu0 %v2735_v4  ;;  %1358 = vmatpush1.bf16.msra.mxu1 %v2738_v5  ;;  %v2833_v4 = vld [vmem:[#allocation5 + $0x2c4] ss:$48 sps:$4 sm:$0xff]   ;;  %v2836_v5 = vld [vmem:[#allocation5 + $0x2cc] ss:$48 sps:$4 sm:$0xff]  }
  0x6b   :  { %1316 = vmatprep.subr.bf16.mxu0 %v2743_v6  ;;  %1359 = vmatprep.subr.bf16.mxu1 %v2746_v7  ;;  %v2831_v6 = vld [vmem:[#allocation5 + $0x2c0] ss:$48 sps:$4 sm:$0xff]   ;;  %v2834_v7 = vld [vmem:[#allocation5 + $0x2c8] ss:$48 sps:$4 sm:$0xff]  }
  0x6c   :  { %1346 = vmatprep.mubr.bf16.mxu0 %v3244_v48  ;;  %1389 = vmatprep.mubr.bf16.mxu1 %v3244_v48 }
  0x6e   :  { %1317 = vmatpush1.bf16.msra.mxu0 %v2741_v8  ;;  %1360 = vmatpush1.bf16.msra.mxu1 %v2744_v9  ;;  %v2839_v8 = vld [vmem:[#allocation5 + $0x264] ss:$48 sps:$4 sm:$0xff]   ;;  %v2842_v9 = vld [vmem:[#allocation5 + $0x26c] ss:$48 sps:$4 sm:$0xff]  }
  0x6f   :  { %1318 = vmatprep.subr.bf16.mxu0 %v2749_v10  ;;  %1361 = vmatprep.subr.bf16.mxu1 %v2752_v11  ;;  %v2837_v10 = vld [vmem:[#allocation5 + $0x260] ss:$48 sps:$4 sm:$0xff]   ;;  %v2840_v11 = vld [vmem:[#allocation5 + $0x268] ss:$48 sps:$4 sm:$0xff]  }
  0x72   :  { %1319 = vmatpush1.bf16.msra.mxu0 %v2747_v12  ;;  %1362 = vmatpush1.bf16.msra.mxu1 %v2750_v13  ;;  %v2845_v12 = vld [vmem:[#allocation5 + $0x204] ss:$48 sps:$4 sm:$0xff]   ;;  %v2848_v13 = vld [vmem:[#allocation5 + $0x20c] ss:$48 sps:$4 sm:$0xff]  }
  0x73   :  { %1320 = vmatprep.subr.bf16.mxu0 %v2755_v14  ;;  %1363 = vmatprep.subr.bf16.mxu1 %v2758_v15  ;;  %v2843_v14 = vld [vmem:[#allocation5 + $0x200] ss:$48 sps:$4 sm:$0xff]   ;;  %v2846_v15 = vld [vmem:[#allocation5 + $0x208] ss:$48 sps:$4 sm:$0xff]  }
  0x76   :  { %1321 = vmatpush1.bf16.msra.mxu0 %v2753_v16  ;;  %1364 = vmatpush1.bf16.msra.mxu1 %v2756_v17  ;;  %v2851_v16 = vld [vmem:[#allocation5 + $0x1a4] ss:$48 sps:$4 sm:$0xff]   ;;  %v2854_v17 = vld [vmem:[#allocation5 + $0x1ac] ss:$48 sps:$4 sm:$0xff]  }
  0x77   :  { %1322 = vmatprep.subr.bf16.mxu0 %v2761_v18  ;;  %1365 = vmatprep.subr.bf16.mxu1 %v2764_v19  ;;  %v2849_v18 = vld [vmem:[#allocation5 + $0x1a0] ss:$48 sps:$4 sm:$0xff]   ;;  %v2852_v19 = vld [vmem:[#allocation5 + $0x1a8] ss:$48 sps:$4 sm:$0xff]  }
  0x7a   :  { %1323 = vmatpush1.bf16.msra.mxu0 %v2759_v20  ;;  %1366 = vmatpush1.bf16.msra.mxu1 %v2762_v21  ;;  %v2857_v20 = vld [vmem:[#allocation5 + $0x144] ss:$48 sps:$4 sm:$0xff]   ;;  %v2860_v21 = vld [vmem:[#allocation5 + $0x14c] ss:$48 sps:$4 sm:$0xff]  }
  0x7b   :  { %1324 = vmatprep.subr.bf16.mxu0 %v2767_v22  ;;  %1367 = vmatprep.subr.bf16.mxu1 %v2770_v23  ;;  %v2855_v22 = vld [vmem:[#allocation5 + $0x140] ss:$48 sps:$4 sm:$0xff]   ;;  %v2858_v23 = vld [vmem:[#allocation5 + $0x148] ss:$48 sps:$4 sm:$0xff]  }
  0x7e   :  { %1325 = vmatpush1.bf16.msra.mxu0 %v2765_v24  ;;  %1368 = vmatpush1.bf16.msra.mxu1 %v2768_v25  ;;  %v2863_v24 = vld [vmem:[#allocation5 + $0xe4] ss:$48 sps:$4 sm:$0xff]   ;;  %v2866_v25 = vld [vmem:[#allocation5 + $0xec] ss:$48 sps:$4 sm:$0xff]  }
  0x7f   :  { %1326 = vmatprep.subr.bf16.mxu0 %v2773_v26  ;;  %1369 = vmatprep.subr.bf16.mxu1 %v2776_v27  ;;  %v2864_v26 = vld [vmem:[#allocation5 + $0xe8] ss:$48 sps:$4 sm:$0xff]   ;;  %v2869_v27 = vld [vmem:[#allocation5 + $0x84] ss:$48 sps:$4 sm:$0xff]  }
  0x82   :  { %1327 = vmatpush1.bf16.msra.mxu0 %v2771_v28  ;;  %1370 = vmatpush1.bf16.msra.mxu1 %v2774_v29  ;;  %v2872_v28 = vld [vmem:[#allocation5 + $0x8c] ss:$48 sps:$4 sm:$0xff]   ;;  %v2867_v29 = vld [vmem:[#allocation5 + $0x80] ss:$48 sps:$4 sm:$0xff]  }
  0x83   :  { %1328 = vmatprep.subr.bf16.mxu0 %v2779_v30  ;;  %1371 = vmatprep.subr.bf16.mxu1 %v2782_v31  ;;  %v2870_v30 = vld [vmem:[#allocation5 + $0x88] ss:$48 sps:$4 sm:$0xff]   ;;  %v2875_v31 = vld [vmem:[#allocation5 + $0x24] ss:$48 sps:$4 sm:$0xff]  }
  0x86   :  { %1329 = vmatpush1.bf16.msra.mxu0 %v2777_v32  ;;  %1372 = vmatpush1.bf16.msra.mxu1 %v2780_v33  ;;  %v2878_v32 = vld [vmem:[#allocation5 + $0x2c] ss:$48 sps:$4 sm:$0xff]   ;;  %v2873_v33 = vld [vmem:[#allocation5 + $0x20] ss:$48 sps:$4 sm:$0xff]  }
  0x87   :  { %1330 = vmatprep.subr.bf16.mxu0 %v2785_v34  ;;  %1373 = vmatprep.subr.bf16.mxu1 %v2788_v35  ;;  %v2876_v34 = vld [vmem:[#allocation5 + $0x28] ss:$48 sps:$4 sm:$0xff]   ;;  %v2881_v35 = vld [vmem:[#allocation5 + $0x5c4] ss:$48 sps:$4 sm:$0xff]  }
  0x8a   :  { %1331 = vmatpush2.bf16.msra.mxu0 %v2783_v36  ;;  %1374 = vmatpush2.bf16.msra.mxu1 %v2786_v37  ;;  %v2884_v36 = vld [vmem:[#allocation5 + $0x5cc] ss:$48 sps:$4 sm:$0xff]   ;;  %v2879_v37 = vld [vmem:[#allocation5 + $0x5c0] ss:$48 sps:$4 sm:$0xff]  }
  0x8b   :  { %1332 = vmatprep.subr.bf16.mxu0 %v2791_v38  ;;  %1375 = vmatprep.subr.bf16.mxu1 %v2794_v39  ;;  %v2882_v38 = vld [vmem:[#allocation5 + $0x5c8] ss:$48 sps:$4 sm:$0xff]   ;;  %v2887_v39 = vld [vmem:[#allocation5 + $0x564] ss:$48 sps:$4 sm:$0xff]  }
  0x8e   :  { %1333 = vmatpush2.bf16.msra.mxu0 %v2789_v40  ;;  %1376 = vmatpush2.bf16.msra.mxu1 %v2792_v41  ;;  %v2890_v40 = vld [vmem:[#allocation5 + $0x56c] ss:$48 sps:$4 sm:$0xff]   ;;  %v2885_v41 = vld [vmem:[#allocation5 + $0x560] ss:$48 sps:$4 sm:$0xff]  }
  0x8f   :  { %1334 = vmatprep.subr.bf16.mxu0 %v2797_v42  ;;  %1377 = vmatprep.subr.bf16.mxu1 %v2800_v43  ;;  %v2888_v42 = vld [vmem:[#allocation5 + $0x568] ss:$48 sps:$4 sm:$0xff]   ;;  %v2893_v43 = vld [vmem:[#allocation5 + $0x504] ss:$48 sps:$4 sm:$0xff]  }
  0x92   :  { %1335 = vmatpush2.bf16.msra.mxu0 %v2795_v44  ;;  %1378 = vmatpush2.bf16.msra.mxu1 %v2798_v45  ;;  %v2896_v44 = vld [vmem:[#allocation5 + $0x50c] ss:$48 sps:$4 sm:$0xff]   ;;  %v2891_v45 = vld [vmem:[#allocation5 + $0x500] ss:$48 sps:$4 sm:$0xff]  }
  0x93   :  { %1336 = vmatprep.subr.bf16.mxu0 %v2803_v46  ;;  %1379 = vmatprep.subr.bf16.mxu1 %v2806_v47  ;;  %v2894_v46 = vld [vmem:[#allocation5 + $0x508] ss:$48 sps:$4 sm:$0xff]   ;;  %v2899_v47 = vld [vmem:[#allocation5 + $0x4a4] ss:$48 sps:$4 sm:$0xff]  }
  0x96   :  { %1337 = vmatpush2.bf16.msra.mxu0 %v2801_v49  ;;  %1380 = vmatpush2.bf16.msra.mxu1 %v2804_v50  ;;  %v2902_v49 = vld [vmem:[#allocation5 + $0x4ac] ss:$48 sps:$4 sm:$0xff]   ;;  %v2897_v50 = vld [vmem:[#allocation5 + $0x4a0] ss:$48 sps:$4 sm:$0xff]  }
  0x97   :  { %1338 = vmatprep.subr.bf16.mxu0 %v2809_v51  ;;  %1381 = vmatprep.subr.bf16.mxu1 %v2812_v52  ;;  %v2900_v51 = vld [vmem:[#allocation5 + $0x4a8] ss:$48 sps:$4 sm:$0xff]   ;;  %v2905_v52 = vld [vmem:[#allocation5 + $0x444] ss:$48 sps:$4 sm:$0xff]  }
  0x9a   :  { %1339 = vmatpush2.bf16.msra.mxu0 %v2807_v53  ;;  %1382 = vmatpush2.bf16.msra.mxu1 %v2810_v54  ;;  %v2908_v53 = vld [vmem:[#allocation5 + $0x44c] ss:$48 sps:$4 sm:$0xff]   ;;  %v2903_v54 = vld [vmem:[#allocation5 + $0x440] ss:$48 sps:$4 sm:$0xff]  }
  0x9b   :  { %1340 = vmatprep.subr.bf16.mxu0 %v2815_v55  ;;  %1383 = vmatprep.subr.bf16.mxu1 %v2818_v56  ;;  %v2906_v55 = vld [vmem:[#allocation5 + $0x448] ss:$48 sps:$4 sm:$0xff]   ;;  %v2911_v56 = vld [vmem:[#allocation5 + $0x3e4] ss:$48 sps:$4 sm:$0xff]  }
  0x9e   :  { %1341 = vmatpush2.bf16.msra.mxu0 %v2813_v57  ;;  %1384 = vmatpush2.bf16.msra.mxu1 %v2816_v58  ;;  %v2914_v57 = vld [vmem:[#allocation5 + $0x3ec] ss:$48 sps:$4 sm:$0xff]   ;;  %v2909_v58 = vld [vmem:[#allocation5 + $0x3e0] ss:$48 sps:$4 sm:$0xff]  }
  0x9f   :  { %1342 = vmatprep.subr.bf16.mxu0 %v2821_v59  ;;  %1385 = vmatprep.subr.bf16.mxu1 %v2824_v60  ;;  %v2912_v59 = vld [vmem:[#allocation5 + $0x3e8] ss:$48 sps:$4 sm:$0xff]   ;;  %v2917_v60 = vld [vmem:[#allocation5 + $0x384] ss:$48 sps:$4 sm:$0xff]  }
  0xa2   :  { %1343 = vmatpush2.bf16.msra.mxu0 %v2819_v61  ;;  %1386 = vmatpush2.bf16.msra.mxu1 %v2822_v62  ;;  %v2920_v61 = vld [vmem:[#allocation5 + $0x38c] ss:$48 sps:$4 sm:$0xff]   ;;  %v2915_v62 = vld [vmem:[#allocation5 + $0x380] ss:$48 sps:$4 sm:$0xff]  }
  0xa3   :  { %1344 = vmatprep.subr.bf16.mxu0 %v2827_v63  ;;  %1387 = vmatprep.subr.bf16.mxu1 %v2830_v0  ;;  %v2918_v63 = vld [vmem:[#allocation5 + $0x388] ss:$48 sps:$4 sm:$0xff]   ;;  %v2923_v0 = vld [vmem:[#allocation5 + $0x324] ss:$48 sps:$4 sm:$0xff]  }
  0xa6   :  { %1345 = vmatpush2.bf16.msra.mxu0 %v2825_v1  ;;  %1388 = vmatpush2.bf16.msra.mxu1 %v2828_v2  ;;  %v2926_v1 = vld [vmem:[#allocation5 + $0x32c] ss:$48 sps:$4 sm:$0xff]   ;;  %v2921_v2 = vld [vmem:[#allocation5 + $0x320] ss:$48 sps:$4 sm:$0xff]  }
  0xa7   :  { %1400 = vmatprep.subr.bf16.mxu0 %v2833_v4  ;;  %1443 = vmatprep.subr.bf16.mxu1 %v2836_v5  ;;  %v2924_v4 = vld [vmem:[#allocation5 + $0x328] ss:$48 sps:$4 sm:$0xff]   ;;  %v2929_v5 = vld [vmem:[#allocation7 + $0x74] ss:$8 sps:$4 sm:$0xff]  }
  0xa9   :  { %1347 = vmatmul.mubr.bf16.vlgmr.msra.gmra.mxu0 %v3248_v3  ;;  %1390 = vmatmul.mubr.bf16.vlgmr.msra.gmra.mxu1 %v3248_v3 }
  0xaa   :  { %1401 = vmatpush1.bf16.msra.mxu0 %v2831_v6  ;;  %1444 = vmatpush1.bf16.msra.mxu1 %v2834_v7  ;;  %v2927_v6 = vld [vmem:[#allocation7 + $0x70] ss:$8 sps:$4 sm:$0xff]   ;;  %v2932_v7 = vld [vmem:[#allocation7 + $0x64] ss:$8 sps:$4 sm:$0xff]  }
  0xab   :  { %1402 = vmatprep.subr.bf16.mxu0 %v2839_v8  ;;  %1445 = vmatprep.subr.bf16.mxu1 %v2842_v9  ;;  %v2930_v8 = vld [vmem:[#allocation7 + $0x60] ss:$8 sps:$4 sm:$0xff]   ;;  %v2935_v9 = vld [vmem:[#allocation7 + $0x54] ss:$8 sps:$4 sm:$0xff]  }
  0xac   :  { %1432 = vmatprep.mubr.bf16.mxu0 %v3244_v48  ;;  %1475 = vmatprep.mubr.bf16.mxu1 %v3244_v48  ;;  %v2861_v48 = vld [vmem:[#allocation5 + $0xe0] ss:$48 sps:$4 sm:$0xff]  }
  0xae   :  { %1403 = vmatpush1.bf16.msra.mxu0 %v2837_v10  ;;  %1446 = vmatpush1.bf16.msra.mxu1 %v2840_v11  ;;  %v2933_v10 = vld [vmem:[#allocation7 + $0x50] ss:$8 sps:$4 sm:$0xff]   ;;  %v2938_v11 = vld [vmem:[#allocation7 + $0x44] ss:$8 sps:$4 sm:$0xff]  }
  0xaf   :  { %1404 = vmatprep.subr.bf16.mxu0 %v2845_v12  ;;  %1447 = vmatprep.subr.bf16.mxu1 %v2848_v13  ;;  %v2936_v12 = vld [vmem:[#allocation7 + $0x40] ss:$8 sps:$4 sm:$0xff]   ;;  %v2941_v13 = vld [vmem:[#allocation7 + $0x34] ss:$8 sps:$4 sm:$0xff]  }
  0xb2   :  { %1405 = vmatpush1.bf16.msra.mxu0 %v2843_v14  ;;  %1448 = vmatpush1.bf16.msra.mxu1 %v2846_v15  ;;  %v2977_v14 = vld [vmem:[#allocation7 + $0x174] ss:$8 sps:$4 sm:$0xff]   ;;  %v2975_v15 = vld [vmem:[#allocation7 + $0x170] ss:$8 sps:$4 sm:$0xff]  }
  0xb3   :  { %1406 = vmatprep.subr.bf16.mxu0 %v2851_v16  ;;  %1449 = vmatprep.subr.bf16.mxu1 %v2854_v17  ;;  %v2939_v16 = vld [vmem:[#allocation7 + $0x30] ss:$8 sps:$4 sm:$0xff]   ;;  %v2944_v17 = vld [vmem:[#allocation7 + $0x24] ss:$8 sps:$4 sm:$0xff]  }
  0xb6   :  { %1407 = vmatpush1.bf16.msra.mxu0 %v2849_v18  ;;  %1450 = vmatpush1.bf16.msra.mxu1 %v2852_v19  ;;  %v2981_v18 = vld [vmem:[#allocation7 + $0x160] ss:$8 sps:$4 sm:$0xff]  }
  0xb7   :  { %1408 = vmatprep.subr.bf16.mxu0 %v2857_v20  ;;  %1451 = vmatprep.subr.bf16.mxu1 %v2860_v21  ;;  %v2942_v19 = vld [vmem:[#allocation7 + $0x20] ss:$8 sps:$4 sm:$0xff]   ;;  %v2947_v20 = vld [vmem:[#allocation7 + $0x14] ss:$8 sps:$4 sm:$0xff]  }
  0xb8   :  { %v2989_v21 = vld [vmem:[#allocation7 + $0x154] ss:$8 sps:$4 sm:$0xff]  }
  0xba   :  { %1409 = vmatpush1.bf16.msra.mxu0 %v2855_v22  ;;  %1452 = vmatpush1.bf16.msra.mxu1 %v2858_v23  ;;  %v2987_v22 = vld [vmem:[#allocation7 + $0x150] ss:$8 sps:$4 sm:$0xff]  }
  0xbb   :  { %1410 = vmatprep.subr.bf16.mxu0 %v2863_v24  ;;  %1453 = vmatprep.subr.bf16.mxu1 %v2866_v25  ;;  %v2945_v23 = vld [vmem:[#allocation7 + $0x10] ss:$8 sps:$4 sm:$0xff]   ;;  %v2950_v24 = vld [vmem:[#allocation7 + $0x4] ss:$8 sps:$4 sm:$0xff]  }
  0xbc   :  { %v2995_v25 = vld [vmem:[#allocation7 + $0x144] ss:$8 sps:$4 sm:$0xff]  }
  0xbe   :  { %1411 = vmatpush1.bf16.msra.mxu0 %v2861_v48  ;;  %1454 = vmatpush1.bf16.msra.mxu1 %v2864_v26  ;;  %v2993_v48 = vld [vmem:[#allocation7 + $0x140] ss:$8 sps:$4 sm:$0xff]  }
  0xbf   :  { %1412 = vmatprep.subr.bf16.mxu0 %v2869_v27  ;;  %1455 = vmatprep.subr.bf16.mxu1 %v2872_v28  ;;  %v2948_v26 = vld [vmem:[#allocation7] ss:$8 sps:$4 sm:$0xff]   ;;  %v2953_v27 = vld [vmem:[#allocation7 + $0xf4] ss:$8 sps:$4 sm:$0xff]  }
  0xc0   :  { %v3001_v28 = vld [vmem:[#allocation7 + $0x134] ss:$8 sps:$4 sm:$0xff]  }
  0xc2   :  { %1413 = vmatpush1.bf16.msra.mxu0 %v2867_v29  ;;  %1456 = vmatpush1.bf16.msra.mxu1 %v2870_v30  ;;  %v2999_v29 = vld [vmem:[#allocation7 + $0x130] ss:$8 sps:$4 sm:$0xff]  }
  0xc3   :  { %1414 = vmatprep.subr.bf16.mxu0 %v2875_v31  ;;  %1457 = vmatprep.subr.bf16.mxu1 %v2878_v32  ;;  %v2951_v30 = vld [vmem:[#allocation7 + $0xf0] ss:$8 sps:$4 sm:$0xff]   ;;  %v2956_v31 = vld [vmem:[#allocation7 + $0xe4] ss:$8 sps:$4 sm:$0xff]  }
  0xc4   :  { %v3007_v32 = vld [vmem:[#allocation7 + $0x124] ss:$8 sps:$4 sm:$0xff]  }
  0xc6   :  { %1415 = vmatpush1.bf16.msra.mxu0 %v2873_v33  ;;  %1458 = vmatpush1.bf16.msra.mxu1 %v2876_v34  ;;  %v3005_v33 = vld [vmem:[#allocation7 + $0x120] ss:$8 sps:$4 sm:$0xff]  }
  0xc7   :  { %1416 = vmatprep.subr.bf16.mxu0 %v2881_v35  ;;  %1459 = vmatprep.subr.bf16.mxu1 %v2884_v36  ;;  %v2954_v34 = vld [vmem:[#allocation7 + $0xe0] ss:$8 sps:$4 sm:$0xff]   ;;  %v2959_v35 = vld [vmem:[#allocation7 + $0xd4] ss:$8 sps:$4 sm:$0xff]  }
  0xc8   :  { %v3013_v36 = vld [vmem:[#allocation7 + $0x114] ss:$8 sps:$4 sm:$0xff]  }
  0xca   :  { %1417 = vmatpush2.bf16.msra.mxu0 %v2879_v37  ;;  %1460 = vmatpush2.bf16.msra.mxu1 %v2882_v38  ;;  %v3011_v37 = vld [vmem:[#allocation7 + $0x110] ss:$8 sps:$4 sm:$0xff]  }
  0xcb   :  { %1418 = vmatprep.subr.bf16.mxu0 %v2887_v39  ;;  %1461 = vmatprep.subr.bf16.mxu1 %v2890_v40  ;;  %v2957_v38 = vld [vmem:[#allocation7 + $0xd0] ss:$8 sps:$4 sm:$0xff]   ;;  %v2962_v39 = vld [vmem:[#allocation7 + $0xc4] ss:$8 sps:$4 sm:$0xff]   ;;  %v3017_v40 = vld [vmem:[#allocation7 + $0x100] ss:$8 sps:$4 sm:$0xff]  }
  0xce   :  { %1419 = vmatpush2.bf16.msra.mxu0 %v2885_v41  ;;  %1462 = vmatpush2.bf16.msra.mxu1 %v2888_v42  ;;  %v3019_v41 = vld [vmem:[#allocation7 + $0x104] ss:$8 sps:$4 sm:$0xff]   ;;  %v2960_v42 = vld [vmem:[#allocation7 + $0xc0] ss:$8 sps:$4 sm:$0xff]  }
  0xcf   :  { %1420 = vmatprep.subr.bf16.mxu0 %v2893_v43  ;;  %1463 = vmatprep.subr.bf16.mxu1 %v2896_v44  ;;  %v3025_v43 = vld [vmem:[#allocation7 + $0x1f4] ss:$8 sps:$4 sm:$0xff]  }
  0xd0   :  { %v2965_v44 = vld [vmem:[#allocation7 + $0xb4] ss:$8 sps:$4 sm:$0xff]  }
  0xd2   :  { %1421 = vmatpush2.bf16.msra.mxu0 %v2891_v45  ;;  %1464 = vmatpush2.bf16.msra.mxu1 %v2894_v46  ;;  %v3023_v45 = vld [vmem:[#allocation7 + $0x1f0] ss:$8 sps:$4 sm:$0xff]  }
  0xd3   :  { %1422 = vmatprep.subr.bf16.mxu0 %v2899_v47  ;;  %1465 = vmatprep.subr.bf16.mxu1 %v2902_v49  ;;  %v2963_v46 = vld [vmem:[#allocation7 + $0xb0] ss:$8 sps:$4 sm:$0xff]   ;;  %v3031_v47 = vld [vmem:[#allocation7 + $0x1e4] ss:$8 sps:$4 sm:$0xff]  }
  0xd4   :  { %v2968_v49 = vld [vmem:[#allocation7 + $0xa4] ss:$8 sps:$4 sm:$0xff]  }
  0xd6   :  { %1423 = vmatpush2.bf16.msra.mxu0 %v2897_v50  ;;  %1466 = vmatpush2.bf16.msra.mxu1 %v2900_v51  ;;  %v3029_v50 = vld [vmem:[#allocation7 + $0x1e0] ss:$8 sps:$4 sm:$0xff]  }
  0xd7   :  { %1424 = vmatprep.subr.bf16.mxu0 %v2905_v52  ;;  %1467 = vmatprep.subr.bf16.mxu1 %v2908_v53  ;;  %v2966_v51 = vld [vmem:[#allocation7 + $0xa0] ss:$8 sps:$4 sm:$0xff]   ;;  %v3037_v52 = vld [vmem:[#allocation7 + $0x1d4] ss:$8 sps:$4 sm:$0xff]  }
  0xd8   :  { %v2971_v53 = vld [vmem:[#allocation7 + $0x94] ss:$8 sps:$4 sm:$0xff]  }
  0xda   :  { %1425 = vmatpush2.bf16.msra.mxu0 %v2903_v54  ;;  %1468 = vmatpush2.bf16.msra.mxu1 %v2906_v55  ;;  %v3035_v54 = vld [vmem:[#allocation7 + $0x1d0] ss:$8 sps:$4 sm:$0xff]  }
  0xdb   :  { %1426 = vmatprep.subr.bf16.mxu0 %v2911_v56  ;;  %1469 = vmatprep.subr.bf16.mxu1 %v2914_v57  ;;  %v2969_v55 = vld [vmem:[#allocation7 + $0x90] ss:$8 sps:$4 sm:$0xff]   ;;  %v3043_v56 = vld [vmem:[#allocation7 + $0x1c4] ss:$8 sps:$4 sm:$0xff]  }
  0xdc   :  { %v2974_v57 = vld [vmem:[#allocation7 + $0x84] ss:$8 sps:$4 sm:$0xff]  }
  0xde   :  { %1427 = vmatpush2.bf16.msra.mxu0 %v2909_v58  ;;  %1470 = vmatpush2.bf16.msra.mxu1 %v2912_v59  ;;  %v3041_v58 = vld [vmem:[#allocation7 + $0x1c0] ss:$8 sps:$4 sm:$0xff]  }
  0xdf   :  { %1428 = vmatprep.subr.bf16.mxu0 %v2917_v60  ;;  %1471 = vmatprep.subr.bf16.mxu1 %v2920_v61  ;;  %v2972_v59 = vld [vmem:[#allocation7 + $0x80] ss:$8 sps:$4 sm:$0xff]   ;;  %v3049_v60 = vld [vmem:[#allocation7 + $0x1b4] ss:$8 sps:$4 sm:$0xff]  }
  0xe0   :  { %v2980_v61 = vld [vmem:[#allocation7 + $0x274] ss:$8 sps:$4 sm:$0xff]  }
  0xe2   :  { %1429 = vmatpush2.bf16.msra.mxu0 %v2915_v62  ;;  %1472 = vmatpush2.bf16.msra.mxu1 %v2918_v63  ;;  %v3047_v62 = vld [vmem:[#allocation7 + $0x1b0] ss:$8 sps:$4 sm:$0xff]   ;;  %v3055_v63 = vld [vmem:[#allocation7 + $0x1a4] ss:$8 sps:$4 sm:$0xff]  }
  0xe3   :  { %1430 = vmatprep.subr.bf16.mxu0 %v2923_v0  ;;  %1473 = vmatprep.subr.bf16.mxu1 %v2926_v1  ;;  %v3053_v0 = vld [vmem:[#allocation7 + $0x1a0] ss:$8 sps:$4 sm:$0xff]   ;;  %v3061_v1 = vld [vmem:[#allocation7 + $0x194] ss:$8 sps:$4 sm:$0xff]  }
  0xe6   :  { %1431 = vmatpush2.bf16.msra.mxu0 %v2921_v2  ;;  %1474 = vmatpush2.bf16.msra.mxu1 %v2924_v4  ;;  %v3059_v2 = vld [vmem:[#allocation7 + $0x190] ss:$8 sps:$4 sm:$0xff]   ;;  %v3067_v4 = vld [vmem:[#allocation7 + $0x184] ss:$8 sps:$4 sm:$0xff]  }
  0xe7   :  { %2168 = vmatprep.subr.bf16.mxu0 %v2929_v5  ;;  %2211 = vmatprep.subr.bf16.mxu1 %v2977_v14  ;;  %v3065_v5 = vld [vmem:[#allocation7 + $0x180] ss:$8 sps:$4 sm:$0xff]  }
  0xe9   :  { %1433 = vmatmul.mubr.bf16.vlgmr.msra.gmra.mxu0 %v3248_v3  ;;  %1476 = vmatmul.mubr.bf16.vlgmr.msra.gmra.mxu1 %v3248_v3  ;;  %v2983_v3 = vld [vmem:[#allocation7 + $0x164] ss:$8 sps:$4 sm:$0xff]  }
  0xea   :  { %2169 = vmatpush1.bf16.msra.mxu0 %v2927_v6  ;;  %2212 = vmatpush1.bf16.msra.mxu1 %v2975_v15 }
  0xeb   :  { %2170 = vmatprep.subr.bf16.mxu0 %v2932_v7  ;;  %2213 = vmatprep.subr.bf16.mxu1 %v2983_v3 }
  0xee   :  { %2171 = vmatpush1.bf16.msra.mxu0 %v2930_v8  ;;  %2214 = vmatpush1.bf16.msra.mxu1 %v2981_v18 }
  0xef   :  { %2172 = vmatprep.subr.bf16.mxu0 %v2935_v9  ;;  %2215 = vmatprep.subr.bf16.mxu1 %v2989_v21 }
  0xf2   :  { %2173 = vmatpush1.bf16.msra.mxu0 %v2933_v10  ;;  %2216 = vmatpush1.bf16.msra.mxu1 %v2987_v22 }
  0xf3   :  { %2174 = vmatprep.subr.bf16.mxu0 %v2938_v11  ;;  %2217 = vmatprep.subr.bf16.mxu1 %v2995_v25 }
  0xf6   :  { %2175 = vmatpush1.bf16.msra.mxu0 %v2936_v12  ;;  %2218 = vmatpush1.bf16.msra.mxu1 %v2993_v48 }
  0xf7   :  { %2176 = vmatprep.subr.bf16.mxu0 %v2941_v13  ;;  %2219 = vmatprep.subr.bf16.mxu1 %v3001_v28 }
  0xfa   :  { %2177 = vmatpush1.bf16.msra.mxu0 %v2939_v16  ;;  %2220 = vmatpush1.bf16.msra.mxu1 %v2999_v29 }
  0xfb   :  { %2178 = vmatprep.subr.bf16.mxu0 %v2944_v17  ;;  %2221 = vmatprep.subr.bf16.mxu1 %v3007_v32 }
  0xfe   :  { %2179 = vmatpush1.bf16.msra.mxu0 %v2942_v19  ;;  %2222 = vmatpush1.bf16.msra.mxu1 %v3005_v33 }
  0xff   :  { %2180 = vmatprep.subr.bf16.mxu0 %v2947_v20  ;;  %2223 = vmatprep.subr.bf16.mxu1 %v3013_v36 }
 0x102   :  { %2181 = vmatpush1.bf16.msra.mxu0 %v2945_v23  ;;  %2224 = vmatpush1.bf16.msra.mxu1 %v3011_v37 }
 0x103   :  { %2182 = vmatprep.subr.bf16.mxu0 %v2950_v24  ;;  %2225 = vmatprep.subr.bf16.mxu1 %v3019_v41  ;;  %v2978_v41 = vld [vmem:[#allocation7 + $0x270] ss:$8 sps:$4 sm:$0xff]  }
 0x106   :  { %2183 = vmatpush1.bf16.msra.mxu0 %v2948_v26  ;;  %2226 = vmatpush1.bf16.msra.mxu1 %v3017_v40 }
 0x107   :  { %2184 = vmatprep.subr.bf16.mxu0 %v2953_v27  ;;  %2227 = vmatprep.subr.bf16.mxu1 %v3025_v43  ;;  %v2986_v43 = vld [vmem:[#allocation7 + $0x264] ss:$8 sps:$4 sm:$0xff]  }
 0x10a   :  { %2185 = vmatpush2.bf16.msra.mxu0 %v2951_v30  ;;  %2228 = vmatpush2.bf16.msra.mxu1 %v3023_v45 }
 0x10b   :  { %2186 = vmatprep.subr.bf16.mxu0 %v2956_v31  ;;  %2229 = vmatprep.subr.bf16.mxu1 %v3031_v47  ;;  %v2990_v47 = vld [vmem:[#allocation7 + $0x250] ss:$8 sps:$4 sm:$0xff]  }
 0x10e   :  { %2187 = vmatpush2.bf16.msra.mxu0 %v2954_v34  ;;  %2230 = vmatpush2.bf16.msra.mxu1 %v3029_v50  ;;  %v2998_v50 = vld [vmem:[#allocation7 + $0x244] ss:$8 sps:$4 sm:$0xff]  }
 0x10f   :  { %2188 = vmatprep.subr.bf16.mxu0 %v2959_v35  ;;  %2231 = vmatprep.subr.bf16.mxu1 %v3037_v52 }
 0x112   :  { %2189 = vmatpush2.bf16.msra.mxu0 %v2957_v38  ;;  %2232 = vmatpush2.bf16.msra.mxu1 %v3035_v54 }
 0x113   :  { %2190 = vmatprep.subr.bf16.mxu0 %v2962_v39  ;;  %2233 = vmatprep.subr.bf16.mxu1 %v3043_v56 }
 0x116   :  { %2191 = vmatpush2.bf16.msra.mxu0 %v2960_v42  ;;  %2234 = vmatpush2.bf16.msra.mxu1 %v3041_v58 }
 0x117   :  { %2192 = vmatprep.subr.bf16.mxu0 %v2965_v44  ;;  %2235 = vmatprep.subr.bf16.mxu1 %v3049_v60  ;;  %v2984_v44 = vld [vmem:[#allocation7 + $0x260] ss:$8 sps:$4 sm:$0xff]   ;;  %v3010_v60 = vld [vmem:[#allocation7 + $0x224] ss:$8 sps:$4 sm:$0xff]  }
 0x11a   :  { %2193 = vmatpush2.bf16.msra.mxu0 %v2963_v46  ;;  %2236 = vmatpush2.bf16.msra.mxu1 %v3047_v62  ;;  %v2992_v46 = vld [vmem:[#allocation7 + $0x254] ss:$8 sps:$4 sm:$0xff]  }
 0x11b   :  { %2194 = vmatprep.subr.bf16.mxu0 %v2968_v49  ;;  %2237 = vmatprep.subr.bf16.mxu1 %v3055_v63 }
 0x11e   :  { %2195 = vmatpush2.bf16.msra.mxu0 %v2966_v51  ;;  %2238 = vmatpush2.bf16.msra.mxu1 %v3053_v0  ;;  %v2996_v51 = vld [vmem:[#allocation7 + $0x240] ss:$8 sps:$4 sm:$0xff]  }
 0x11f   :  { %2196 = vmatprep.subr.bf16.mxu0 %v2971_v53  ;;  %2239 = vmatprep.subr.bf16.mxu1 %v3061_v1  ;;  %v3004_v53 = vld [vmem:[#allocation7 + $0x234] ss:$8 sps:$4 sm:$0xff]   ;;  %v3008_v0 = vld [vmem:[#allocation7 + $0x220] ss:$8 sps:$4 sm:$0xff]  }
 0x122   :  { %2197 = vmatpush2.bf16.msra.mxu0 %v2969_v55  ;;  %2240 = vmatpush2.bf16.msra.mxu1 %v3059_v2  ;;  %v3016_v2 = vld [vmem:[#allocation7 + $0x214] ss:$8 sps:$4 sm:$0xff]  }
 0x123   :  { %2198 = vmatprep.subr.bf16.mxu0 %v2974_v57  ;;  %2241 = vmatprep.subr.bf16.mxu1 %v3067_v4  ;;  %v3002_v57 = vld [vmem:[#allocation7 + $0x230] ss:$8 sps:$4 sm:$0xff]  }
 0x124   :  { %v3014_v4 = vld [vmem:[#allocation7 + $0x210] ss:$8 sps:$4 sm:$0xff]  }
 0x126   :  { %2199 = vmatpush2.bf16.msra.mxu0 %v2972_v59  ;;  %2242 = vmatpush2.bf16.msra.mxu1 %v3065_v5  ;;  %v3022_v5 = vld [vmem:[#allocation7 + $0x204] ss:$8 sps:$4 sm:$0xff]  }
 0x127   :  { %2254 = vmatprep.subr.bf16.mxu0 %v2980_v61 }
 0x129   :  { %v1262_v6 = vpop.f32.mrf.mxu0  ;;  %v3260_v21 = vpop.f32.mrf.mxu1 }
 0x12a   :  { %v2517_v13 = vmul.f32 -1.442695, %v1262_v6  ;;  %v2519_v54 = vmul.f32 -1.442695, %v3260_v21 }
 0x12b   :  { %v1264_v7 = vpop.f32.mrf.mxu0  ;;  %v3262_v22 = vpop.f32.mrf.mxu1 }
 0x12c   :  { %v2518_v10 = vmul.f32 -1.442695, %v1264_v7  ;;  %v2520_v55 = vmul.f32 -1.442695, %v3262_v22 }
 0x12d   :  { %v1266_v8 = vpop.f32.mrf.mxu0  ;;  %v3264_v23 = vpop.f32.mrf.mxu1 }
 0x12e   :  { %v2523_v11 = vmul.f32 -1.442695, %v1266_v8  ;;  %3071 = vpow2.f32 %v2518_v10  ;;  %v2525_v56 = vmul.f32 -1.442695, %v3264_v23  ;;  %v3026_v10 = vld [vmem:[#allocation7 + $0x2f0] ss:$8 sps:$4 sm:$0xff]  }
 0x12f   :  { %v1268_v9 = vpop.f32.mrf.mxu0  ;;  %v3266_v24 = vpop.f32.mrf.mxu1 }
 0x130   :  { %v2524_v12 = vmul.f32 -1.442695, %v1268_v9  ;;  %3073 = vpow2.f32 %v2523_v11  ;;  %v2526_v58 = vmul.f32 -1.442695, %v3266_v24 }
 0x132   :  { %3075 = vpow2.f32 %v2524_v12  ;;  %v3034_v12 = vld [vmem:[#allocation7 + $0x2e4] ss:$8 sps:$4 sm:$0xff]  }
 0x133   :  { %3077 = vpow2.f32 %v2517_v13 }
 0x13b   :  { %v3072_v14 = vpop.eup %3071 }
 0x13c   :  { %v1523_v3 = vadd.f32 1.0, %v3072_v14 }
 0x13d   :  { %v3074_v15 = vpop.eup %3073 }
 0x13e   :  { %v1528_v18 = vadd.f32 1.0, %v3074_v15  ;;  %3079 = vrcp.f32 %v1523_v3 }
 0x13f   :  { %v3076_v16 = vpop.eup %3075 }
 0x140   :  { %v3078_v17 = vpop.eup %3077  ;;  %v1529_v19 = vadd.f32 1.0, %v3076_v16  ;;  %3081 = vrcp.f32 %v1528_v18  ;;  %v3032_v18 = vld [vmem:[#allocation7 + $0x2e0] ss:$8 sps:$4 sm:$0xff]  }
 0x141   :  { %v1522_v20 = vadd.f32 1.0, %v3078_v17 }
 0x142   :  { %3083 = vrcp.f32 %v1529_v19 }
 0x143   :  { %3085 = vrcp.f32 %v1522_v20 }
 0x144   :  { %3087 = vpow2.f32 %v2519_v54  ;;  %v3070_v54 = vld [vmem:[#allocation7 + $0x284] ss:$8 sps:$4 sm:$0xff]  }
 0x145   :  { %3089 = vpow2.f32 %v2520_v55 }
 0x146   :  { %3091 = vpow2.f32 %v2525_v56 }
 0x147   :  { %3093 = vpow2.f32 %v2526_v58 }
 0x14b   :  { %v3080_v25 = vpop.eup %3079 }
 0x14c   :  { %v1559_v32 = vmul.f32 %v3080_v25, %v1264_v7  ;;  %v3028_v7 = vld [vmem:[#allocation7 + $0x2f4] ss:$8 sps:$4 sm:$0xff]  }
 0x14d   :  { %v3082_v26 = vpop.eup %3081  ;;  %v3040_v25 = vld [vmem:[#allocation7 + $0x2d4] ss:$8 sps:$4 sm:$0xff]  }
 0x14e   :  { %v1564_v30 = vmul.f32 %v3082_v26, %v1266_v8 }
 0x14f   :  { %v3084_v27 = vpop.eup %3083 }
 0x150   :  { %v3086_v29 = vpop.eup %3085  ;;  %v1565_v33 = vmul.f32 %v3084_v27, %v1268_v9 }
 0x151   :  { %v1558_v34 = vmul.f32 %v3086_v29, %v1262_v6  ;;  %v3020_v6 = vld [vmem:[#allocation7 + $0x200] ss:$8 sps:$4 sm:$0xff]   ;;  %v3088_v8 = vpop.eup %3087  ;;  %v3038_v29 = vld [vmem:[#allocation7 + $0x2d0] ss:$8 sps:$4 sm:$0xff]  }
 0x152   :  { %v3090_v9 = vpop.eup %3089  ;;  %v1524_v14 = vadd.f32 1.0, %v3088_v8 }
 0x153   :  { %v3092_v11 = vpop.eup %3091  ;;  %v1525_v16 = vadd.f32 1.0, %v3090_v9 }
 0x154   :  { %v3094_v13 = vpop.eup %3093  ;;  %v1530_v3 = vadd.f32 1.0, %v3092_v11 }
 0x155   :  { %v1531_v20 = vadd.f32 1.0, %v3094_v13 }
 0x169   :  { %v1391_v48 = vpop.f32.mrf.mxu1  ;;  %v3268_v45 = vpop.f32.mrf.mxu0 }
 0x16a   :  { %v1570_v39 = vmul.f32 %v1558_v34, %v1391_v48  ;;  %v2521_v1 = vmul.f32 -1.442695, %v3268_v45  ;;  %v3050_v34 = vld [vmem:[#allocation7 + $0x2b0] ss:$8 sps:$4 sm:$0xff]  }
 0x16b   :  { %v1393_v28 = vpop.f32.mrf.mxu1  ;;  %v3270_v49 = vpop.f32.mrf.mxu0 }
 0x16c   :  { %v1571_v37 = vmul.f32 %v1559_v32, %v1393_v28  ;;  %v2522_v61 = vmul.f32 -1.442695, %v3270_v49  ;;  %v3044_v32 = vld [vmem:[#allocation7 + $0x2c0] ss:$8 sps:$4 sm:$0xff]  }
 0x16d   :  { %v1395_v31 = vpop.f32.mrf.mxu1  ;;  %v3272_v52 = vpop.f32.mrf.mxu0 }
 0x16e   :  { %v1576_v35 = vmul.f32 %v1564_v30, %v1395_v31  ;;  %v2527_v62 = vmul.f32 -1.442695, %v3272_v52  ;;  %3095 = vpow2.f32 %v2522_v61  ;;  %v3046_v31 = vld [vmem:[#allocation7 + $0x2c4] ss:$8 sps:$4 sm:$0xff]  }
 0x16f   :  { %v1397_v36 = vpop.f32.mrf.mxu1  ;;  %v3278_v59 = vpop.f32.mrf.mxu0 }
 0x170   :  { %v1577_v38 = vmul.f32 %v1565_v33, %v1397_v36  ;;  %v1582_v42 = vpack.c.bf16 %v1576_v35, %v1570_v39  ;;  %v2528_v63 = vmul.f32 -1.442695, %v3278_v59  ;;  %3097 = vpow2.f32 %v2527_v62  ;;  %v3052_v33 = vld [vmem:[#allocation7 + $0x2b4] ss:$8 sps:$4 sm:$0xff]   ;;  %v3058_v35 = vld [vmem:[#allocation7 + $0x2a4] ss:$8 sps:$4 sm:$0xff]  }
 0x172   :  { %v1583_v40 = vpack.c.bf16 %v1577_v38, %v1571_v37  ;;  %3099 = vpow2.f32 %v2528_v63  ;;  %v3056_v38 = vld [vmem:[#allocation7 + $0x2a0] ss:$8 sps:$4 sm:$0xff]  }
 0x173   :  { %3101 = vpow2.f32 %v2521_v1 }
 0x174   :  { %2200 = vmatprep.mubr.bf16.mxu0 %v1583_v40  ;;  %3103 = vrcp.f32 %v1524_v14  ;;  %v3064_v40 = vld [vmem:[#allocation7 + $0x294] ss:$8 sps:$4 sm:$0xff]  }
 0x175   :  { %2201 = vmatmul.mubr.bf16.vlgmr.msra.gmra.mxu0 %v1582_v42  ;;  %3105 = vrcp.f32 %v1525_v16 }
 0x176   :  { %2255 = vmatpush1.bf16.msra.mxu0 %v2978_v41  ;;  %3107 = vrcp.f32 %v1530_v3 }
 0x177   :  { %2256 = vmatprep.subr.bf16.mxu0 %v2986_v43  ;;  %3109 = vrcp.f32 %v1531_v20 }
 0x17a   :  { %2257 = vmatpush1.bf16.msra.mxu0 %v2984_v44 }
 0x17b   :  { %2258 = vmatprep.subr.bf16.mxu0 %v2992_v46  ;;  %v3096_v15 = vpop.eup %3095 }
 0x17c   :  { %v1527_v26 = vadd.f32 1.0, %v3096_v15 }
 0x17d   :  { %v3098_v17 = vpop.eup %3097 }
 0x17e   :  { %2259 = vmatpush1.bf16.msra.mxu0 %v2990_v47  ;;  %v1532_v27 = vadd.f32 1.0, %v3098_v17  ;;  %3111 = vrcp.f32 %v1527_v26  ;;  %v3062_v47 = vld [vmem:[#allocation7 + $0x290] ss:$8 sps:$4 sm:$0xff]  }
 0x17f   :  { %2260 = vmatprep.subr.bf16.mxu0 %v2998_v50  ;;  %v3100_v19 = vpop.eup %3099 }
 0x180   :  { %v3102_v48 = vpop.eup %3101  ;;  %v1533_v28 = vadd.f32 1.0, %v3100_v19  ;;  %3113 = vrcp.f32 %v1532_v27 }
 0x181   :  { %v1526_v30 = vadd.f32 1.0, %v3102_v48  ;;  %v3104_v36 = vpop.eup %3103 }
 0x182   :  { %2261 = vmatpush1.bf16.msra.mxu0 %v2996_v51  ;;  %3115 = vrcp.f32 %v1533_v28  ;;  %v3106_v37 = vpop.eup %3105  ;;  %v1560_v56 = vmul.f32 %v3104_v36, %v3260_v21 }
 0x183   :  { %2262 = vmatprep.subr.bf16.mxu0 %v3004_v53  ;;  %3117 = vrcp.f32 %v1526_v30  ;;  %v3108_v39 = vpop.eup %3107  ;;  %v1561_v58 = vmul.f32 %v3106_v37, %v3262_v22 }
 0x184   :  { %v3110_v41 = vpop.eup %3109 }
 0x186   :  { %2263 = vmatpush1.bf16.msra.mxu0 %v3002_v57  ;;  %v1566_v57 = vmul.f32 %v3108_v39, %v3264_v23 }
 0x187   :  { %2264 = vmatprep.subr.bf16.mxu0 %v3010_v60  ;;  %v1567_v60 = vmul.f32 %v3110_v41, %v3266_v24 }
 0x18a   :  { %2265 = vmatpush1.bf16.msra.mxu0 %v3008_v0 }
 0x18b   :  { %2266 = vmatprep.subr.bf16.mxu0 %v3016_v2  ;;  %v3112_v42 = vpop.eup %3111 }
 0x18c   :  { %v1563_v0 = vmul.f32 %v3112_v42, %v3270_v49 }
 0x18d   :  { %v3114_v46 = vpop.eup %3113 }
 0x18e   :  { %2267 = vmatpush1.bf16.msra.mxu0 %v3014_v4  ;;  %v1568_v61 = vmul.f32 %v3114_v46, %v3272_v52 }
 0x18f   :  { %2268 = vmatprep.subr.bf16.mxu0 %v3022_v5  ;;  %v3116_v50 = vpop.eup %3115  ;;  %v3068_v5 = vld [vmem:[#allocation7 + $0x280] ss:$8 sps:$4 sm:$0xff]  }
 0x190   :  { %v3118_v55 = vpop.eup %3117  ;;  %v1569_v1 = vmul.f32 %v3116_v50, %v3278_v59 }
 0x191   :  { %v1562_v21 = vmul.f32 %v3118_v55, %v3268_v45 }
 0x192   :  { %2269 = vmatpush1.bf16.msra.mxu0 %v3020_v6 }
 0x193   :  { %2270 = vmatprep.subr.bf16.mxu0 %v3028_v7 }
 0x196   :  { %2271 = vmatpush2.bf16.msra.mxu0 %v3026_v10 }
 0x197   :  { %2272 = vmatprep.subr.bf16.mxu0 %v3034_v12 }
 0x19a   :  { %2273 = vmatpush2.bf16.msra.mxu0 %v3032_v18 }
 0x19b   :  { %2274 = vmatprep.subr.bf16.mxu0 %v3040_v25 }
 0x19e   :  { %2275 = vmatpush2.bf16.msra.mxu0 %v3038_v29 }
 0x19f   :  { %2276 = vmatprep.subr.bf16.mxu0 %v3046_v31 }
 0x1a2   :  { %2277 = vmatpush2.bf16.msra.mxu0 %v3044_v32 }
 0x1a3   :  { %2278 = vmatprep.subr.bf16.mxu0 %v3052_v33 }
 0x1a6   :  { %2279 = vmatpush2.bf16.msra.mxu0 %v3050_v34 }
 0x1a7   :  { %2280 = vmatprep.subr.bf16.mxu0 %v3058_v35 }
 0x1a9   :  { %v1434_v43 = vpop.f32.mrf.mxu0  ;;  %v1477_v44 = vpop.f32.mrf.mxu1 }
 0x1aa   :  { %2281 = vmatpush2.bf16.msra.mxu0 %v3056_v38  ;;  %v1572_v2 = vmul.f32 %v1560_v56, %v1434_v43  ;;  %v1574_v10 = vmul.f32 %v1562_v21, %v1477_v44 }
 0x1ab   :  { %v1436_v51 = vpop.f32.mrf.mxu0  ;;  %v1479_v53 = vpop.f32.mrf.mxu1  ;;  %2282 = vmatprep.subr.bf16.mxu0 %v3064_v40 }
 0x1ac   :  { %v1573_v6 = vmul.f32 %v1561_v58, %v1436_v51  ;;  %v1575_v24 = vmul.f32 %v1563_v0, %v1479_v53 }
 0x1ad   :  { %v1438_v62 = vpop.f32.mrf.mxu0  ;;  %v1481_v63 = vpop.f32.mrf.mxu1 }
 0x1ae   :  { %v1578_v4 = vmul.f32 %v1566_v57, %v1438_v62  ;;  %2283 = vmatpush2.bf16.msra.mxu0 %v3062_v47  ;;  %v1580_v23 = vmul.f32 %v1568_v61, %v1481_v63 }
 0x1af   :  { %v1440_v7 = vpop.f32.mrf.mxu0  ;;  %v1483_v22 = vpop.f32.mrf.mxu1  ;;  %2284 = vmatprep.subr.bf16.mxu0 %v3070_v54 }
 0x1b0   :  { %v1584_v8 = vpack.c.bf16 %v1578_v4, %v1572_v2  ;;  %v1579_v52 = vmul.f32 %v1567_v60, %v1440_v7  ;;  %v1581_v9 = vmul.f32 %v1569_v1, %v1483_v22  ;;  %v1586_v59 = vpack.c.bf16 %v1580_v23, %v1574_v10 }
 0x1b2   :  { %v1585_v11 = vpack.c.bf16 %v1579_v52, %v1573_v6  ;;  %v1587_v49 = vpack.c.bf16 %v1581_v9, %v1575_v24  ;;  %2285 = vmatpush2.bf16.msra.mxu0 %v3068_v5 }
 0x1b4   :  { %2243 = vmatprep.mubr.bf16.mxu1 %v1585_v11  ;;  %2286 = vmatprep.mubr.bf16.mxu0 %v1587_v49 }
 0x1b5   :  { %2244 = vmatmul.mubr.bf16.vlgmr.msra.gmra.mxu1 %v1584_v8  ;;  %2287 = vmatmul.mubr.bf16.vlgmr.msra.gmra.mxu0 %v1586_v59 }
 0x235   :  { %v2202_v12 = vpop.f32.mrf.mxu0 }
 0x237   :  { %v2204_v45 = vpop.f32.mrf.mxu0 }
 0x239   :  { %v2206_v13 = vpop.f32.mrf.mxu0 }
 0x23b   :  { %v2208_v14 = vpop.f32.mrf.mxu0 }
 0x275   :  { %v2245_v15 = vpop.f32.mrf.mxu1  ;;  %v2288_v16 = vpop.f32.mrf.mxu0 }
 0x276   :  { %v2246_v17 = vadd.f32 %v2245_v15, %v2202_v12 }
 0x277   :  { %v2247_v3 = vpop.f32.mrf.mxu1  ;;  %v2290_v18 = vpop.f32.mrf.mxu0 }
 0x278   :  { %v2289_v19 = vadd.f32 %v2288_v16, %v2246_v17  ;;  %v2248_v20 = vadd.f32 %v2247_v3, %v2204_v45 }
 0x279   :  { %v2249_v25 = vpop.f32.mrf.mxu1  ;;  %v2292_v48 = vpop.f32.mrf.mxu0 }
 0x27a   :  { %v2291_v26 = vadd.f32 %v2290_v18, %v2248_v20  ;;  %v2250_v27 = vadd.f32 %v2249_v25, %v2206_v13  ;;  %2301 = vst [vmem:[#allocation8] sm:$0xff] %v2289_v19 }
 0x27b   :  { %v2251_v28 = vpop.f32.mrf.mxu1  ;;  %v2294_v31 = vpop.f32.mrf.mxu0 }
 0x27c   :  { %v2293_v29 = vadd.f32 %v2292_v48, %v2250_v27  ;;  %v2252_v30 = vadd.f32 %v2251_v28, %v2208_v14  ;;  %2302 = vst [vmem:[#allocation8 + $0x8] sm:$0xff] %v2291_v26 }
 0x27e   :  { %v2295_v32 = vadd.f32 %v2294_v31, %v2252_v30  ;;  %2303 = vst [vmem:[#allocation8 + $0x10] sm:$0xff] %v2293_v29 }
 0x280   :  { %2304 = vst [vmem:[#allocation8 + $0x18] sm:$0xff] %v2295_v32 }
 0x281   :  { %3190 = shalt.err (!%p3187_p5)
}
 0x282   :  { %s3213_s4 = smov 256   ;;  %s3214_s5 = smov 16  }
 0x283   :  { %2316 = dma.vmem_to_hbm [thread:$0]  %s2311_s2, 512, %s3298_s3, [#allocation4], %s3213_s4, %s3213_s4, %s3214_s5  }
 0x284   :  { %3203 = dma.done.wait [#allocation4], 512  }
 0x285   :  { %3204 = vsyncadd [#allocation4], 4294966784 }
 0x286   :  { %2320 = vsyncpa [#allocation3], 1 }
 0x287   :  { %2321 = vsyncpa [#allocation6], 1 }
 0x288   :  { %2322 = vsyncpa [#allocation4], 1 }

</bundles_post_ra>
